<compile_context>
chip_gen: v6e
topology: v6e:2x2x1
jax: 0.10.0
libtpu: 0.0.40
codegen_flags: <defaults>
</compile_context>

<pallas_src>
import math
from functools import partial

import jax
import jax.numpy as jnp
import numpy as np
from jax.experimental import pallas as pl
from jax.experimental.pallas import tpu as pltpu

_LANE = 128
_SUBLANE = 8


def _round_up(n, m):
    return ((n + m - 1) // m) * m


def _choose_batch_tile(S_p, D_p, T_p, A_p, max_batch_tile=None,
                       vmem_budget_bytes=12 * 1024 * 1024):
    """Pick a batch tile so double-buffered I/O tiles + live intermediates fit the budget."""
    per_row = 4 * (3 * S_p * D_p          # mem tile + context temporaries
                   + 2 * S_p * A_p        # uh / wquh intermediates
                   + 4 * T_p + D_p        # x, h_y, h_c, ctx_c
                   + 4 * S_p)             # u, alpha, log_alpha, sample
    cap = max_batch_tile if max_batch_tile is not None else 512
    bt = 512
    while bt > 8 and (bt > cap or 2 * bt * per_row > vmem_budget_bytes):
        bt //= 2
    return bt


def _va_kernel(x_ref, mem_ref, u_ref,
               wqT_ref, wcT_ref, v_ref, woutT_in_ref, woutT_ctx_ref, bout_ref,
               h_y_ref, h_c_ref, ctx_c_ref, alpha_ref, log_alpha_ref, sample_ref,
               *, inv_temperature, s_valid, matmul_dtype):
    f32 = jnp.float32
    md = matmul_dtype

    x = x_ref[...]                    # [Bt, T]   (query tile, one-step)
    mem = mem_ref[...]                # [Bt, S, D] (memory_bank tile)
    u = u_ref[...]                    # [Bt, S]   (uniform base noise, K=1)

    wqT = wqT_ref[...]                # [T, A]  (linear_query.weight, pre-transposed)
    wcT = wcT_ref[...]                # [D, A]  (linear_context.weight, pre-transposed)
    v = v_ref[...]                    # [1, A]  (v.weight)
    woutT_in = woutT_in_ref[...]      # [T, T]  (linear_out.weight[:, :T].T)
    woutT_ctx = woutT_ctx_ref[...]    # [D, T]  (linear_out.weight[:, T:].T)
    bout = bout_ref[...]              # [1, T]  (linear_out.bias)

    Bt, S, D = mem.shape

    # ---- score(): MLP attention, all projections on the MXU with f32 accumulation ----
    wq_t = jnp.dot(x.astype(md), wqT.astype(md), preferred_element_type=f32)      # [Bt, A]
    mem2 = mem.reshape(Bt * S, D)   # free view: Bt and S are multiples of 8
    uh = jnp.dot(mem2.astype(md), wcT.astype(md),
                 preferred_element_type=f32).reshape(Bt, S, -1)                    # [Bt, S, A]
    wquh = jnp.tanh(wq_t[:, None, :] + uh)                                         # EUP
    scores = jnp.sum(wquh * v[:, None, :], axis=-1)                                # [Bt, S]
    # TODO(synk): if profiling shows the XLU lane-reduce saturated, switch the line above
    # to a skinny MXU matmul (wquh.reshape(Bt*S, A) @ v.T).

    if s_valid < S:  # mask wrapper-padded source positions (static condition)
        col = jax.lax.broadcasted_iota(jnp.int32, (Bt, S), 1)
        scores = jnp.where(col < s_valid, scores, -jnp.inf)

    # ---- log_softmax / softmax: single exp, EUP reciprocal for the denominator ----
    m = jnp.max(scores, axis=-1, keepdims=True)
    z = scores - m
    e = jnp.exp(z)
    s_sum = jnp.sum(e, axis=-1, keepdims=True)
    log_alpha = z - jnp.log(s_sum)                                                 # [Bt, S]
    alpha = e * pl.reciprocal(s_sum, approx=True)                                  # [Bt, S]

    # ---- gumbel-softmax resample of the prior attention (mode='gumbel', K=1) ----
    eps = 1e-20
    g = -jnp.log(-jnp.log(u + eps) + eps)
    xg = (log_alpha + g) * inv_temperature        # static 1/T multiply
    mg = jnp.max(xg, axis=-1, keepdims=True)
    eg = jnp.exp(xg - mg)
    sample = eg * pl.reciprocal(jnp.sum(eg, axis=-1, keepdims=True), approx=True)  # [Bt, S]

    # ---- both context vectors in ONE batched MXU pass over the memory tile ----
    w2 = jnp.concatenate([alpha[:, None, :], sample[:, None, :]], axis=1)          # [Bt, 2, S]
    ctx = jnp.einsum('bks,bsd->bkd', w2.astype(md), mem.astype(md),
                     preferred_element_type=f32)                                   # [Bt, 2, D]
    ctx_c = ctx[:, 0, :]
    ctx_y = ctx[:, 1, :]

    # ---- h = tanh(linear_out([input, context])): shared x-projection, fused ctx matmul ----
    xw = jnp.dot(x.astype(md), woutT_in.astype(md), preferred_element_type=f32)    # [Bt, T]
    ctx_cat = jnp.concatenate([ctx_c, ctx_y], axis=0)                              # [2Bt, D]
    cw = jnp.dot(ctx_cat.astype(md), woutT_ctx.astype(md),
                 preferred_element_type=f32)                                        # [2Bt, T]
    h_c = jnp.tanh(xw + cw[:Bt] + bout)
    h_y = jnp.tanh(xw + cw[Bt:] + bout)

    h_y_ref[...] = h_y.astype(h_y_ref.dtype)
    h_c_ref[...] = h_c.astype(h_c_ref.dtype)
    ctx_c_ref[...] = ctx_c.astype(ctx_c_ref.dtype)
    alpha_ref[...] = alpha.astype(alpha_ref.dtype)
    log_alpha_ref[...] = log_alpha.astype(log_alpha_ref.dtype)
    sample_ref[...] = sample.astype(sample_ref.dtype)


def variational_attention(x, mem, params, u, temperature, *,
                          matmul_dtype=jnp.float32, max_batch_tile=None):
    """One-step VariationalAttention forward (mlp attention, gumbel sampling, K=1)."""
    B, tgt_dim = x.shape
    _, S, src_dim = mem.shape
    attn_dim = params["wq"].shape[0]

    # Lane-dense feature dims, sublane-aligned S / batch tile (zero-padding is exact
    # for this math except padded source positions, which are -inf masked in-kernel).
    T_p = _round_up(tgt_dim, _LANE)
    D_p = _round_up(src_dim, _LANE)
    A_p = _round_up(attn_dim, _LANE)
    S_p = _round_up(S, _SUBLANE)

    bt = _choose_batch_tile(S_p, D_p, T_p, A_p, max_batch_tile=max_batch_tile)
    if bt >= B:
        bt = _round_up(B, _SUBLANE)
    B_p = _round_up(B, bt)

    def pad2(a, r, c):
        return jnp.pad(a, ((0, r - a.shape[0]), (0, c - a.shape[1])))

    x_p = pad2(x, B_p, T_p)
    u_p = pad2(u, B_p, S_p)
    mem_p = jnp.pad(mem, ((0, B_p - B), (0, S_p - S), (0, D_p - src_dim)))

    # Pre-transpose weights in the wrapper so the kernel never transposes on the XLU.
    wqT = pad2(params["wq"], A_p, T_p).T           # [T_p, A_p]
    wcT = pad2(params["wc"], A_p, D_p).T           # [D_p, A_p]
    v_p = pad2(params["v"], 1, A_p)                # [1,  A_p]
    woutT_in = pad2(params["wout_in"], T_p, T_p).T     # [T_p, T_p]
    woutT_ctx = pad2(params["wout_ctx"], T_p, D_p).T   # [D_p, T_p]
    bout_p = pad2(params["bout"], 1, T_p)          # [1, T_p]

    grid = (B_p // bt,)

    def tile2(rows, cols):
        return pl.BlockSpec((rows, cols), lambda i: (i, 0))

    def wspec(shape):
        return pl.BlockSpec(shape, lambda i: (0,) * len(shape))

    in_specs = [
        tile2(bt, T_p),                                    # x
        pl.BlockSpec((bt, S_p, D_p), lambda i: (i, 0, 0)),  # mem
        tile2(bt, S_p),                                    # u
        wspec((T_p, A_p)), wspec((D_p, A_p)), wspec((1, A_p)),
        wspec((T_p, T_p)), wspec((D_p, T_p)), wspec((1, T_p)),
    ]
    out_specs = (tile2(bt, T_p), tile2(bt, T_p), tile2(bt, D_p),
                 tile2(bt, S_p), tile2(bt, S_p), tile2(bt, S_p))
    out_shapes = (
        jax.ShapeDtypeStruct((B_p, T_p), jnp.float32),   # h_y
        jax.ShapeDtypeStruct((B_p, T_p), jnp.float32),   # h_c
        jax.ShapeDtypeStruct((B_p, D_p), jnp.float32),   # context_c
        jax.ShapeDtypeStruct((B_p, S_p), jnp.float32),   # alpha (c_align_vectors)
        jax.ShapeDtypeStruct((B_p, S_p), jnp.float32),   # log_alpha
        jax.ShapeDtypeStruct((B_p, S_p), jnp.float32),   # gumbel sample
    )

    kernel = partial(_va_kernel,
                     inv_temperature=1.0 / float(temperature),
                     s_valid=S,
                     matmul_dtype=matmul_dtype)

    h_y, h_c, ctx_c, alpha, log_alpha, sample = pl.pallas_call(
        kernel,
        grid=grid,
        in_specs=in_specs,
        out_specs=out_specs,
        out_shape=out_shapes,
        compiler_params=pltpu.CompilerParams(
            dimension_semantics=("parallel",),       # v7x: 2 TCs split the batch grid
            vmem_limit_bytes=32 * 1024 * 1024),      # safe on v7x's smaller scoped VMEM
    )(x_p, mem_p, u_p, wqT, wcT, v_p, woutT_in, woutT_ctx, bout_p)

    # strip wrapper padding
    h_y = h_y[:B, :tgt_dim]
    h_c = h_c[:B, :tgt_dim]
    ctx_c = ctx_c[:B, :src_dim]
    alpha = alpha[:B, :S]
    log_alpha = log_alpha[:B, :S]
    sample = sample[:B, :S]

    # PyTorch one_step return packaging (K = n_samples = 1):
    h_y = h_y[None]               # [K, B, tgt_dim]
    samples = sample[:, None, :]  # [B, T=1, S]
    dist_info = {
        "q": None,
        "p": {"alpha": alpha, "log_alpha": log_alpha,
              "dist_type": "categorical", "samples": samples},
    }
    return h_y, h_c, ctx_c, alpha, dist_info


def _reference(x, mem, params, u, temperature):
    """Pure-jnp reference of the same math (for a correctness check)."""
    wq_t = x @ params["wq"].T
    uh = jnp.einsum("bsd,ad->bsa", mem, params["wc"])
    wquh = jnp.tanh(wq_t[:, None, :] + uh)
    scores = jnp.einsum("bsa,a->bs", wquh, params["v"][0])
    log_alpha = jax.nn.log_softmax(scores, axis=-1)
    alpha = jnp.exp(log_alpha)
    ctx_c = jnp.einsum("bs,bsd->bd", alpha, mem)
    h_c = jnp.tanh(x @ params["wout_in"].T + ctx_c @ params["wout_ctx"].T + params["bout"])
    eps = 1e-20
    g = -jnp.log(-jnp.log(u + eps) + eps)
    sample = jax.nn.softmax((log_alpha + g) / temperature, axis=-1)
    ctx_y = jnp.einsum("bs,bsd->bd", sample, mem)
    h_y = jnp.tanh(x @ params["wout_in"].T + ctx_y @ params["wout_ctx"].T + params["bout"])
    return h_y[None], h_c, ctx_c, alpha, log_alpha, sample


if __name__ == "__main__":
    B, S = 16, 8
    src_dim = tgt_dim = attn_dim = 32
    temperature = 0.75

    key = jax.random.PRNGKey(0)
    k_x, k_mem, k_u, kq, kc, kv, kw, kb = jax.random.split(key, 8)

    x = jax.random.normal(k_x, (B, tgt_dim), jnp.float32)          # one-step query [B, tgt_dim]
    mem = jax.random.normal(k_mem, (B, S, src_dim), jnp.float32)   # memory bank [B, S, src_dim]
    u = jax.random.uniform(k_u, (B, S), jnp.float32)               # uniform base for gumbel (K=1)

    def lin(k, out_f, in_f):  # deterministic nn.Linear-style init: U(-1/sqrt(in), 1/sqrt(in))
        bound = 1.0 / math.sqrt(in_f)
        return jax.random.uniform(k, (out_f, in_f), jnp.float32, -bound, bound)

    wq = lin(kq, attn_dim, tgt_dim)                # linear_query.weight
    wc = lin(kc, attn_dim, src_dim)                # linear_context.weight
    v = lin(kv, 1, attn_dim)                       # v.weight
    wout = lin(kw, tgt_dim, src_dim + tgt_dim)     # linear_out.weight (cat order: [input, context])
    b_bound = 1.0 / math.sqrt(src_dim + tgt_dim)
    bout = jax.random.uniform(kb, (1, tgt_dim), jnp.float32, -b_bound, b_bound)

    params = dict(wq=wq, wc=wc, v=v,
                  wout_in=wout[:, :tgt_dim], wout_ctx=wout[:, tgt_dim:], bout=bout)

    # max_batch_tile=8 -> grid of 2 steps here, exercising the pipelined/parallel path.
    h_y, h_c, ctx_c, align, dist_info = variational_attention(
        x, mem, params, u, temperature, max_batch_tile=8)
    jax.block_until_ready((h_y, h_c, ctx_c, align, dist_info))

    # correctness check against pure-jnp reference.
    # tol: the softmax denominators use the EUP approximate reciprocal, so outputs that
    # depend on the normalization are checked at 5e-3; log_alpha (exact path) at 1e-5.
    r_h_y, r_h_c, r_ctx_c, r_alpha, r_log_alpha, r_sample = _reference(x, mem, params, u, temperature)
    tol = dict(rtol=5e-3, atol=5e-3)
    np.testing.assert_allclose(np.asarray(h_y), np.asarray(r_h_y), **tol)
    np.testing.assert_allclose(np.asarray(h_c), np.asarray(r_h_c), **tol)
    np.testing.assert_allclose(np.asarray(ctx_c), np.asarray(r_ctx_c), **tol)
    np.testing.assert_allclose(np.asarray(align), np.asarray(r_alpha), **tol)
    np.testing.assert_allclose(np.asarray(dist_info["p"]["samples"][:, 0, :]),
                               np.asarray(r_sample), **tol)
    np.testing.assert_allclose(np.asarray(dist_info["p"]["log_alpha"]),
                               np.asarray(r_log_alpha), rtol=1e-5, atol=1e-5)

    # TODO(synk): mode='sample'/'wsram' (torch.distributions categorical draw + scatter/gather)
    # and memory_lengths masking are not implemented; this kernel covers the gumbel branch.
    print("KERNEL_OK")
</pallas_src>

<mosaic_0001>
module attributes {stable_mosaic.version = 11 : i64} {
  func.func @_va_kernel(%arg0: i32, %arg1: memref<8x128xf32, #tpu.memory_space<vmem>>, %arg2: memref<8x8x128xf32, #tpu.memory_space<vmem>>, %arg3: memref<8x8xf32, #tpu.memory_space<vmem>>, %arg4: memref<128x128xf32, #tpu.memory_space<vmem>>, %arg5: memref<128x128xf32, #tpu.memory_space<vmem>>, %arg6: memref<1x128xf32, #tpu.memory_space<vmem>>, %arg7: memref<128x128xf32, #tpu.memory_space<vmem>>, %arg8: memref<128x128xf32, #tpu.memory_space<vmem>>, %arg9: memref<1x128xf32, #tpu.memory_space<vmem>>, %arg10: memref<8x128xf32, #tpu.memory_space<vmem>>, %arg11: memref<8x128xf32, #tpu.memory_space<vmem>>, %arg12: memref<8x128xf32, #tpu.memory_space<vmem>>, %arg13: memref<8x8xf32, #tpu.memory_space<vmem>>, %arg14: memref<8x8xf32, #tpu.memory_space<vmem>>, %arg15: memref<8x8xf32, #tpu.memory_space<vmem>>) attributes {dimension_semantics = [#tpu.dimension_semantics<parallel>], iteration_bounds = array<i64: 2>, scalar_prefetch = 0 : i64, scratch_operands = 0 : i64, tpu.core_type = #tpu.core_type<tc>, window_params = [{transform_indices = @transform_0, window_bounds = array<i64: 8, 128>}, {transform_indices = @transform_1, window_bounds = array<i64: 8, 8, 128>}, {transform_indices = @transform_2, window_bounds = array<i64: 8, 8>}, {pipeline_mode = #tpu.pipeline_mode<synchronous>, transform_indices = @transform_3, window_bounds = array<i64: 128, 128>}, {pipeline_mode = #tpu.pipeline_mode<synchronous>, transform_indices = @transform_4, window_bounds = array<i64: 128, 128>}, {pipeline_mode = #tpu.pipeline_mode<synchronous>, transform_indices = @transform_5, window_bounds = array<i64: 1, 128>}, {pipeline_mode = #tpu.pipeline_mode<synchronous>, transform_indices = @transform_6, window_bounds = array<i64: 128, 128>}, {pipeline_mode = #tpu.pipeline_mode<synchronous>, transform_indices = @transform_7, window_bounds = array<i64: 128, 128>}, {pipeline_mode = #tpu.pipeline_mode<synchronous>, transform_indices = @transform_8, window_bounds = array<i64: 1, 128>}, {transform_indices = @transform_9, window_bounds = array<i64: 8, 128>}, {transform_indices = @transform_10, window_bounds = array<i64: 8, 128>}, {transform_indices = @transform_11, window_bounds = array<i64: 8, 128>}, {transform_indices = @transform_12, window_bounds = array<i64: 8, 8>}, {transform_indices = @transform_13, window_bounds = array<i64: 8, 8>}, {transform_indices = @transform_14, window_bounds = array<i64: 8, 8>}]} {
    %c0 = arith.constant 0 : index
    %c0_0 = arith.constant 0 : index
    %0 = vector.load %arg1[%c0, %c0_0] : memref<8x128xf32, #tpu.memory_space<vmem>>, vector<8x128xf32>
    %c0_1 = arith.constant 0 : index
    %c0_2 = arith.constant 0 : index
    %c0_3 = arith.constant 0 : index
    %1 = vector.load %arg2[%c0_1, %c0_2, %c0_3] : memref<8x8x128xf32, #tpu.memory_space<vmem>>, vector<8x8x128xf32>
    %c0_4 = arith.constant 0 : index
    %c0_5 = arith.constant 0 : index
    %2 = vector.load %arg3[%c0_4, %c0_5] : memref<8x8xf32, #tpu.memory_space<vmem>>, vector<8x8xf32>
    %c0_6 = arith.constant 0 : index
    %c0_7 = arith.constant 0 : index
    %3 = vector.load %arg4[%c0_6, %c0_7] : memref<128x128xf32, #tpu.memory_space<vmem>>, vector<128x128xf32>
    %c0_8 = arith.constant 0 : index
    %c0_9 = arith.constant 0 : index
    %4 = vector.load %arg5[%c0_8, %c0_9] : memref<128x128xf32, #tpu.memory_space<vmem>>, vector<128x128xf32>
    %c0_10 = arith.constant 0 : index
    %c0_11 = arith.constant 0 : index
    %5 = vector.load %arg6[%c0_10, %c0_11] : memref<1x128xf32, #tpu.memory_space<vmem>>, vector<1x128xf32>
    %c0_12 = arith.constant 0 : index
    %c0_13 = arith.constant 0 : index
    %6 = vector.load %arg7[%c0_12, %c0_13] : memref<128x128xf32, #tpu.memory_space<vmem>>, vector<128x128xf32>
    %c0_14 = arith.constant 0 : index
    %c0_15 = arith.constant 0 : index
    %7 = vector.load %arg8[%c0_14, %c0_15] : memref<128x128xf32, #tpu.memory_space<vmem>>, vector<128x128xf32>
    %c0_16 = arith.constant 0 : index
    %c0_17 = arith.constant 0 : index
    %8 = vector.load %arg9[%c0_16, %c0_17] : memref<1x128xf32, #tpu.memory_space<vmem>>, vector<1x128xf32>
    %cst = arith.constant dense<0.000000e+00> : vector<8x128xf32>
    %9 = tpu.matmul %0, %3, %cst {dimension_numbers = #tpu.dot_dimension_numbers<[1], [0], [0], [1], [0, 0, 1, 1], [], []>} : vector<8x128xf32>, vector<128x128xf32>, vector<8x128xf32> -> vector<8x128xf32>
    %10 = vector.shape_cast %1 : vector<8x8x128xf32> to vector<64x128xf32>
    %cst_18 = arith.constant dense<0.000000e+00> : vector<64x128xf32>
    %11 = tpu.matmul %10, %4, %cst_18 {dimension_numbers = #tpu.dot_dimension_numbers<[1], [0], [0], [1], [0, 0, 1, 1], [], []>} : vector<64x128xf32>, vector<128x128xf32>, vector<64x128xf32> -> vector<64x128xf32>
    %12 = vector.shape_cast %11 : vector<64x128xf32> to vector<8x8x128xf32>
    %13 = vector.shape_cast %9 : vector<8x128xf32> to vector<8x1x128xf32>
    %14 = vector.broadcast %13 : vector<8x1x128xf32> to vector<8x8x128xf32>
    %15 = arith.addf %14, %12 : vector<8x8x128xf32>
    %16 = math.tanh %15 : vector<8x8x128xf32>
    %17 = vector.shape_cast %5 : vector<1x128xf32> to vector<1x1x128xf32>
    %18 = vector.broadcast %17 : vector<1x1x128xf32> to vector<8x8x128xf32>
    %19 = arith.mulf %16, %18 : vector<8x8x128xf32>
    %cst_19 = arith.constant dense<0.000000e+00> : vector<8x8xf32>
    %20 = vector.multi_reduction <add>, %19, %cst_19 [2] : vector<8x8x128xf32> to vector<8x8xf32>
    %cst_20 = arith.constant dense<0xFF800000> : vector<8xf32>
    %21 = vector.multi_reduction <maximumf>, %20, %cst_20 [1] : vector<8x8xf32> to vector<8xf32>
    %22 = vector.shape_cast %21 : vector<8xf32> to vector<8x1xf32>
    %23 = vector.broadcast %22 : vector<8x1xf32> to vector<8x8xf32>
    %24 = arith.subf %20, %23 : vector<8x8xf32>
    %25 = math.exp %24 : vector<8x8xf32>
    %cst_21 = arith.constant dense<0.000000e+00> : vector<8xf32>
    %26 = vector.multi_reduction <add>, %25, %cst_21 [1] : vector<8x8xf32> to vector<8xf32>
    %27 = vector.shape_cast %26 : vector<8xf32> to vector<8x1xf32>
    %28 = math.log %27 : vector<8x1xf32>
    %29 = vector.broadcast %28 : vector<8x1xf32> to vector<8x8xf32>
    %30 = arith.subf %24, %29 : vector<8x8xf32>
    %31 = tpu.reciprocal %27 {approx = true} : vector<8x1xf32> -> vector<8x1xf32>
    %32 = vector.broadcast %31 : vector<8x1xf32> to vector<8x8xf32>
    %33 = arith.mulf %25, %32 : vector<8x8xf32>
    %cst_22 = arith.constant 9.99999968E-21 : f32
    %34 = vector.broadcast %cst_22 : f32 to vector<8x8xf32>
    %35 = arith.addf %2, %34 : vector<8x8xf32>
    %36 = math.log %35 : vector<8x8xf32>
    %cst_23 = arith.constant 0.000000e+00 : f32
    %37 = vector.broadcast %cst_23 : f32 to vector<8x8xf32>
    %38 = arith.subf %37, %36 : vector<8x8xf32>
    %cst_24 = arith.constant 9.99999968E-21 : f32
    %39 = vector.broadcast %cst_24 : f32 to vector<8x8xf32>
    %40 = arith.addf %38, %39 : vector<8x8xf32>
    %41 = math.log %40 : vector<8x8xf32>
    %cst_25 = arith.constant 0.000000e+00 : f32
    %42 = vector.broadcast %cst_25 : f32 to vector<8x8xf32>
    %43 = arith.subf %42, %41 : vector<8x8xf32>
    %44 = arith.addf %30, %43 : vector<8x8xf32>
    %cst_26 = arith.constant 1.33333337 : f32
    %45 = vector.broadcast %cst_26 : f32 to vector<8x8xf32>
    %46 = arith.mulf %44, %45 : vector<8x8xf32>
    %cst_27 = arith.constant dense<0xFF800000> : vector<8xf32>
    %47 = vector.multi_reduction <maximumf>, %46, %cst_27 [1] : vector<8x8xf32> to vector<8xf32>
    %48 = vector.shape_cast %47 : vector<8xf32> to vector<8x1xf32>
    %49 = vector.broadcast %48 : vector<8x1xf32> to vector<8x8xf32>
    %50 = arith.subf %46, %49 : vector<8x8xf32>
    %51 = math.exp %50 : vector<8x8xf32>
    %cst_28 = arith.constant dense<0.000000e+00> : vector<8xf32>
    %52 = vector.multi_reduction <add>, %51, %cst_28 [1] : vector<8x8xf32> to vector<8xf32>
    %53 = vector.shape_cast %52 : vector<8xf32> to vector<8x1xf32>
    %54 = tpu.reciprocal %53 {approx = true} : vector<8x1xf32> -> vector<8x1xf32>
    %55 = vector.broadcast %54 : vector<8x1xf32> to vector<8x8xf32>
    %56 = arith.mulf %51, %55 : vector<8x8xf32>
    %57 = vector.shape_cast %33 : vector<8x8xf32> to vector<8x1x8xf32>
    %58 = vector.shape_cast %56 : vector<8x8xf32> to vector<8x1x8xf32>
    %59 = tpu.concatenate %57, %58 in 1 : vector<8x1x8xf32>, vector<8x1x8xf32> -> vector<8x2x8xf32>
    "tpu.trace_start"() <{level = 10 : i32, message = "bks,bsd->bkd"}> : () -> ()
    %cst_29 = arith.constant dense<0.000000e+00> : vector<8x2x128xf32>
    %60 = tpu.matmul %59, %1, %cst_29 {dimension_numbers = #tpu.dot_dimension_numbers<[2], [1], [1], [2], [0, 0, 0, 1, 1, 2], [0], [0]>} : vector<8x2x8xf32>, vector<8x8x128xf32>, vector<8x2x128xf32> -> vector<8x2x128xf32>
    "tpu.trace_stop"() : () -> ()
    %61 = vector.extract_strided_slice %60 {offsets = [0, 0, 0], sizes = [8, 1, 128], strides = [1, 1, 1]} : vector<8x2x128xf32> to vector<8x1x128xf32>
    %62 = vector.shape_cast %61 : vector<8x1x128xf32> to vector<8x128xf32>
    %63 = vector.extract_strided_slice %60 {offsets = [0, 1, 0], sizes = [8, 1, 128], strides = [1, 1, 1]} : vector<8x2x128xf32> to vector<8x1x128xf32>
    %64 = vector.shape_cast %63 : vector<8x1x128xf32> to vector<8x128xf32>
    %cst_30 = arith.constant dense<0.000000e+00> : vector<8x128xf32>
    %65 = tpu.matmul %0, %6, %cst_30 {dimension_numbers = #tpu.dot_dimension_numbers<[1], [0], [0], [1], [0, 0, 1, 1], [], []>} : vector<8x128xf32>, vector<128x128xf32>, vector<8x128xf32> -> vector<8x128xf32>
    %66 = tpu.concatenate %62, %64 in 0 : vector<8x128xf32>, vector<8x128xf32> -> vector<16x128xf32>
    %cst_31 = arith.constant dense<0.000000e+00> : vector<16x128xf32>
    %67 = tpu.matmul %66, %7, %cst_31 {dimension_numbers = #tpu.dot_dimension_numbers<[1], [0], [0], [1], [0, 0, 1, 1], [], []>} : vector<16x128xf32>, vector<128x128xf32>, vector<16x128xf32> -> vector<16x128xf32>
    %68 = vector.extract_strided_slice %67 {offsets = [0, 0], sizes = [8, 128], strides = [1, 1]} : vector<16x128xf32> to vector<8x128xf32>
    %69 = arith.addf %65, %68 : vector<8x128xf32>
    %70 = vector.broadcast %8 : vector<1x128xf32> to vector<8x128xf32>
    %71 = arith.addf %69, %70 : vector<8x128xf32>
    %72 = math.tanh %71 : vector<8x128xf32>
    %73 = vector.extract_strided_slice %67 {offsets = [8, 0], sizes = [8, 128], strides = [1, 1]} : vector<16x128xf32> to vector<8x128xf32>
    %74 = arith.addf %65, %73 : vector<8x128xf32>
    %75 = vector.broadcast %8 : vector<1x128xf32> to vector<8x128xf32>
    %76 = arith.addf %74, %75 : vector<8x128xf32>
    %77 = math.tanh %76 : vector<8x128xf32>
    %c0_32 = arith.constant 0 : index
    %c0_33 = arith.constant 0 : index
    %78 = vector.load %arg10[%c0_32, %c0_33] : memref<8x128xf32, #tpu.memory_space<vmem>>, vector<8x128xf32>
    tpu.vector_store %arg10[%c0_32, %c0_33], %77 {strides = array<i32>} : memref<8x128xf32, #tpu.memory_space<vmem>>, vector<8x128xf32>,
    %c0_34 = arith.constant 0 : index
    %c0_35 = arith.constant 0 : index
    %79 = vector.load %arg11[%c0_34, %c0_35] : memref<8x128xf32, #tpu.memory_space<vmem>>, vector<8x128xf32>
    tpu.vector_store %arg11[%c0_34, %c0_35], %72 {strides = array<i32>} : memref<8x128xf32, #tpu.memory_space<vmem>>, vector<8x128xf32>,
    %c0_36 = arith.constant 0 : index
    %c0_37 = arith.constant 0 : index
    %80 = vector.load %arg12[%c0_36, %c0_37] : memref<8x128xf32, #tpu.memory_space<vmem>>, vector<8x128xf32>
    tpu.vector_store %arg12[%c0_36, %c0_37], %62 {strides = array<i32>} : memref<8x128xf32, #tpu.memory_space<vmem>>, vector<8x128xf32>,
    %c0_38 = arith.constant 0 : index
    %c0_39 = arith.constant 0 : index
    %81 = vector.load %arg13[%c0_38, %c0_39] : memref<8x8xf32, #tpu.memory_space<vmem>>, vector<8x8xf32>
    tpu.vector_store %arg13[%c0_38, %c0_39], %33 {strides = array<i32>} : memref<8x8xf32, #tpu.memory_space<vmem>>, vector<8x8xf32>,
    %c0_40 = arith.constant 0 : index
    %c0_41 = arith.constant 0 : index
    %82 = vector.load %arg14[%c0_40, %c0_41] : memref<8x8xf32, #tpu.memory_space<vmem>>, vector<8x8xf32>
    tpu.vector_store %arg14[%c0_40, %c0_41], %30 {strides = array<i32>} : memref<8x8xf32, #tpu.memory_space<vmem>>, vector<8x8xf32>,
    %c0_42 = arith.constant 0 : index
    %c0_43 = arith.constant 0 : index
    %83 = vector.load %arg15[%c0_42, %c0_43] : memref<8x8xf32, #tpu.memory_space<vmem>>, vector<8x8xf32>
    tpu.vector_store %arg15[%c0_42, %c0_43], %56 {strides = array<i32>} : memref<8x8xf32, #tpu.memory_space<vmem>>, vector<8x8xf32>,
    return
  }
  func.func @transform_0(%arg0: i32) -> (i32, i32) {
    %c0_i32 = arith.constant 0 : i32
    %c0_i32_0 = arith.constant 0 : i32
    return %arg0, %c0_i32 : i32, i32
  }
  func.func @transform_1(%arg0: i32) -> (i32, i32, i32) {
    %c0_i32 = arith.constant 0 : i32
    %c0_i32_0 = arith.constant 0 : i32
    %c0_i32_1 = arith.constant 0 : i32
    return %arg0, %c0_i32, %c0_i32_0 : i32, i32, i32
  }
  func.func @transform_2(%arg0: i32) -> (i32, i32) {
    %c0_i32 = arith.constant 0 : i32
    %c0_i32_0 = arith.constant 0 : i32
    return %arg0, %c0_i32 : i32, i32
  }
  func.func @transform_3(%arg0: i32) -> (i32, i32) {
    %c0_i32 = arith.constant 0 : i32
    %c0_i32_0 = arith.constant 0 : i32
    %c0_i32_1 = arith.constant 0 : i32
    return %c0_i32, %c0_i32_0 : i32, i32
  }
  func.func @transform_4(%arg0: i32) -> (i32, i32) {
    %c0_i32 = arith.constant 0 : i32
    %c0_i32_0 = arith.constant 0 : i32
    %c0_i32_1 = arith.constant 0 : i32
    return %c0_i32, %c0_i32_0 : i32, i32
  }
  func.func @transform_5(%arg0: i32) -> (i32, i32) {
    %c0_i32 = arith.constant 0 : i32
    %c0_i32_0 = arith.constant 0 : i32
    %c0_i32_1 = arith.constant 0 : i32
    return %c0_i32, %c0_i32_0 : i32, i32
  }
  func.func @transform_6(%arg0: i32) -> (i32, i32) {
    %c0_i32 = arith.constant 0 : i32
    %c0_i32_0 = arith.constant 0 : i32
    %c0_i32_1 = arith.constant 0 : i32
    return %c0_i32, %c0_i32_0 : i32, i32
  }
  func.func @transform_7(%arg0: i32) -> (i32, i32) {
    %c0_i32 = arith.constant 0 : i32
    %c0_i32_0 = arith.constant 0 : i32
    %c0_i32_1 = arith.constant 0 : i32
    return %c0_i32, %c0_i32_0 : i32, i32
  }
  func.func @transform_8(%arg0: i32) -> (i32, i32) {
    %c0_i32 = arith.constant 0 : i32
    %c0_i32_0 = arith.constant 0 : i32
    %c0_i32_1 = arith.constant 0 : i32
    return %c0_i32, %c0_i32_0 : i32, i32
  }
  func.func @transform_9(%arg0: i32) -> (i32, i32) {
    %c0_i32 = arith.constant 0 : i32
    %c0_i32_0 = arith.constant 0 : i32
    return %arg0, %c0_i32 : i32, i32
  }
  func.func @transform_10(%arg0: i32) -> (i32, i32) {
    %c0_i32 = arith.constant 0 : i32
    %c0_i32_0 = arith.constant 0 : i32
    return %arg0, %c0_i32 : i32, i32
  }
  func.func @transform_11(%arg0: i32) -> (i32, i32) {
    %c0_i32 = arith.constant 0 : i32
    %c0_i32_0 = arith.constant 0 : i32
    return %arg0, %c0_i32 : i32, i32
  }
  func.func @transform_12(%arg0: i32) -> (i32, i32) {
    %c0_i32 = arith.constant 0 : i32
    %c0_i32_0 = arith.constant 0 : i32
    return %arg0, %c0_i32 : i32, i32
  }
  func.func @transform_13(%arg0: i32) -> (i32, i32) {
    %c0_i32 = arith.constant 0 : i32
    %c0_i32_0 = arith.constant 0 : i32
    return %arg0, %c0_i32 : i32, i32
  }
  func.func @transform_14(%arg0: i32) -> (i32, i32) {
    %c0_i32 = arith.constant 0 : i32
    %c0_i32_0 = arith.constant 0 : i32
    return %arg0, %c0_i32 : i32, i32
  }
}

</mosaic_0001>

<bundles_post_ra>
// kernel: tpu_custom_call.1
= control target key start
LH: loop header
LB: loop body
LE: loop exit
PB: predicated region body
PF: predicated region fallthrough
CT: control target
= control target key end

     0   :  { %s4673_s0 = inlined_call_operand.vmem [shape: f32[16,128], index: 0, kind: input, shape index: {}]   ;;  %s4674_s1 = inlined_call_operand.hbm [shape: f32[16,8,128], index: 1, kind: input, shape index: {}]   ;;  %s4675_s2 = inlined_call_operand.vmem [shape: f32[16,8], index: 2, kind: input, shape index: {}]   ;;  %s4676_s3 = inlined_call_operand.hbm [shape: f32[128,128], index: 3, kind: input, shape index: {}]   ;;  %s4677_s4 = inlined_call_operand.hbm [shape: f32[128,128], index: 4, kind: input, shape index: {}]   ;;  %s4678_s5 = inlined_call_operand.vmem [shape: f32[1,128], index: 5, kind: input, shape index: {}]   ;;  %s4679_s6 = inlined_call_operand.hbm [shape: f32[128,128], index: 6, kind: input, shape index: {}]   ;;  %s4680_s7 = inlined_call_operand.hbm [shape: f32[128,128], index: 7, kind: input, shape index: {}]   ;;  %s4681_s8 = inlined_call_operand.vmem [shape: f32[1,128], index: 8, kind: input, shape index: {}]   ;;  %s4682_s9 = inlined_call_operand.hbm [shape: f32[16,128], index: 9, kind: output, shape index: {0}]   ;;  %s4683_s10 = inlined_call_operand.hbm [shape: f32[16,128], index: 10, kind: output, shape index: {1}]   ;;  %s4684_s11 = inlined_call_operand.hbm [shape: f32[16,128], index: 11, kind: output, shape index: {2}]   ;;  %s4685_s12 = inlined_call_operand.vmem [shape: f32[16,8], index: 12, kind: output, shape index: {3}]   ;;  %s4686_s13 = inlined_call_operand.vmem [shape: f32[16,8], index: 13, kind: output, shape index: {4}]   ;;  %s4687_s14 = inlined_call_operand.vmem [shape: f32[16,8], index: 14, kind: output, shape index: {5}]  }
   0x1   :  { %4699 = sst [smem:[#allocation23_spill]] %s4673_s0 }
   0x2   :  { %4700 = sst [smem:[#allocation24_spill]] %s4674_s1 }
   0x3   :  { %4701 = sst [smem:[#allocation25_spill]] %s4675_s2 }
   0x4   :  { %4702 = sst [smem:[#allocation26_spill]] %s4676_s3 }
   0x5   :  { %4703 = sst [smem:[#allocation27_spill]] %s4677_s4 }
   0x6   :  { %4704 = sst [smem:[#allocation28_spill]] %s4678_s5 }
   0x7   :  { %4705 = sst [smem:[#allocation29_spill]] %s4679_s6 }
   0x8   :  { %4706 = sst [smem:[#allocation30_spill]] %s4680_s7 }
   0x9   :  { %4707 = sst [smem:[#allocation31_spill]] %s4684_s11 }
   0xa   :  { %20 = vsyncpa [#allocation3], 0 }
   0xb   :  { %22 = vsyncpa [#allocation3 + $0x1], 0 }
   0xc   :  { %23 = vsyncpa [#allocation6], 0 }
   0xd   :  { %24 = vsyncpa [#allocation9], 0 }
   0xe   :  { %25 = vsyncpa [#allocation4], 0 }
   0xf   :  { %27 = vsyncpa [#allocation4 + $0x1], 0 }
  0x10   :  { %28 = vsyncpa [#allocation13], 0 }
  0x11   :  { %30 = vsyncpa [#allocation13 + $0x1], 0  ;;  %s3876_s29 = smov 0   ;;  %s3878_s30 = smov 0  }
  0x12   :  { %s3880_s15 = smov 0   ;;  %s3882_s16 = smov 0  }
  0x13 LB: > { %4708 = sst [smem:[#allocation20_spill]] %s3773_s29  ;;  %s3897_s17 = sadd.s32 4294967295, %s3785_s16   ;;  %s3785_s16 = sphi %s3882_s16, %s4746_s16   ;;  %s3781_s15 = sphi %s3880_s15, %s4745_s15   ;;  %s3777_s30 = sphi %s3878_s30, %s4744_s30   ;;  %s3773_s29 = sphi %s3876_s29, %s4743_s29  }
  0x14   : > { %s4688_s18 = sadd.s32 4294967294, %s3785_s16   ;;  %p82_p0 = scmp.ne.s32.totalorder %s3777_s30, %s3773_s29 }
  0x15   : > { %p4692_p1 = scmp.eq.s32.totalorder %s3897_s17, 0  ;;  %p258_p2 = scmp.eq.s32.totalorder %s3897_s17, 1 }
  0x16   : > { %p264_p3 = scmp.eq.s32.totalorder %s4688_s18, 1  ;;  %p3033_p5 = scmp.ge.s32.totalorder %s3785_s16, 1 }
  0x17   : > { %p3908_p4 = por %p4692_p1, %p82_p0  ;;  %p401_p7 = scmp.lt.s32.totalorder %s3785_s16, 3 }
  0x18   : > { %p3913_p6 = por %p264_p3, %p82_p0  ;;  %s3787_s22 = smov [#allocation5]  }
  0x19   : > { %s4709_s19 = scalar_select %p3908_p4, 1, 0 }
  0x1a   : > { %s4710_s20 = scalar_select %p3913_p6, 1, 0 }
  0x1b   : > { %p3918_p8 = pnand %p3033_p5, %p401_p7  ;;  %s413_s23 = sshll.u32 %s3787_s22, 4  ;;  %s414_s23 = int_to_ptr.vmem [resolvable:$true] %s413_s23 }
  0x1c   : > { %4711 = sst [smem:[#allocation21_spill]] %s4710_s20  ;;  %s3788_s25 = smov [#allocation8]  }
  0x1d   : > { %s4712_s21 = scalar_select %p3918_p8, 1, 0 }
  0x1e   : > { %p3380_p9 = pneg %p3918_p8  ;;  %s442_s26 = sshll.u32 %s3788_s25, 4  ;;  %s443_s26 = int_to_ptr.vmem [resolvable:$true] %s442_s26 }
  0x1f   : > { %s3789_s27 = smov [#allocation7]   ;;  %s3536_s18 = scalar_lea.vmem %s414_s23, 2048 }
  0x20   : > { %p3927_p11 = pnand %p3380_p9, %p4692_p1  ;;  %s426_s28 = sshll.u32 %s3789_s27, 4  ;;  %s427_s28 = int_to_ptr.vmem [resolvable:$true] %s426_s28 }
  0x21   : > { %p3537_p13 = scmp.ne.s32.totalorder %s414_s23, %s3536_s18  ;;  %p3544_p5 = scmp.lt.s32.totalorder %s414_s23, %s414_s23 }
  0x22   : > { %p3527_p12 = pneg %p3927_p11  ;;  %p3545_p7 = scmp.lt.s32.totalorder %s3536_s18, %s3536_s18 }
  0x24   : > { %p3539_p0 = pnand %p3537_p13, %p3527_p12  ;;  %p3546_p9 = por %p3545_p7, %p3544_p5 }
  0x26   : > { %p3540_p3 = pneg %p3539_p0 }
  0x28   : > { %p3547_p10 = pnand %p3546_p9, %p3540_p3 }
  0x2a   : > { %3550 = shalt.err (!%p3547_p10)
}
  0x2b   : > { %s4693_s22 = smov 128   ;;  %s4694_s25 = smov 8  }
  0x2c   : > { %s4714_s3 = sld [smem:[#allocation26_spill]]  ;;  %s3562_s29 = scalar_lea.vmem %s443_s26, 2048 }
  0x2d   : > { %p3563_p13 = scmp.ne.s32.totalorder %s443_s26, %s3562_s29  ;;  %p3570_p3 = scmp.lt.s32.totalorder %s443_s26, %s443_s26 }
  0x2e   : > { %p3571_p10 = scmp.lt.s32.totalorder %s3562_s29, %s3562_s29 }
  0x2f   : > { %p3565_p0 = pnand %p3563_p13, %p3527_p12 }
  0x30   : > { %p3572_p7 = por %p3571_p10, %p3570_p3 }
  0x31   : > { %p3566_p5 = pneg %p3565_p0 }
  0x32   : > { %3383 = dma.hbm_to_vmem [thread:$0]  (!%p3927_p11), %s4714_s3, 2048, %s414_s23, [#allocation6], %s4693_s22, %s4693_s22, %s4694_s25  }
  0x33   : > { %p3573_p9 = pnand %p3572_p7, %p3566_p5 }
  0x35   : > { %3576 = shalt.err (!%p3573_p9)
}
  0x36   : > { %s4715_s6 = sld [smem:[#allocation29_spill]]  ;;  %s3588_s20 = scalar_lea.vmem %s427_s28, 2048 }
  0x37   : > { %p3589_p1 = scmp.ne.s32.totalorder %s427_s28, %s3588_s20  ;;  %p3596_p3 = scmp.lt.s32.totalorder %s427_s28, %s427_s28 }
  0x38   : > { %p3597_p5 = scmp.lt.s32.totalorder %s3588_s20, %s3588_s20 }
  0x39   : > { %p3591_p13 = pnand %p3589_p1, %p3527_p12 }
  0x3a   : > { %p3598_p10 = por %p3597_p5, %p3596_p3 }
  0x3b   : > { %p3592_p0 = pneg %p3591_p13 }
  0x3c   : > { %3389 = dma.hbm_to_vmem [thread:$0]  (!%p3927_p11), %s4715_s6, 2048, %s443_s26, [#allocation9], %s4693_s22, %s4693_s22, %s4694_s25  }
  0x3d   : > { %p3599_p7 = pnand %p3598_p10, %p3592_p0 }
  0x3f   : > { %3602 = shalt.err (!%p3599_p7)
}
  0x40   : > { %s4716_s4 = sld [smem:[#allocation27_spill]]  ;;  %s3792_s23 = smov [#allocation10]  }
  0x41   : > { %s455_s26 = sshll.u32 %s3792_s23, 4  ;;  %s456_s26 = int_to_ptr.vmem [resolvable:$true] %s455_s26 }
  0x42   : > { %s3614_s27 = scalar_lea.vmem %s456_s26, 2048  ;;  %p3622_p0 = scmp.lt.s32.totalorder %s456_s26, %s456_s26 }
  0x43   : > { %p3615_p1 = scmp.ne.s32.totalorder %s456_s26, %s3614_s27  ;;  %p3623_p3 = scmp.lt.s32.totalorder %s3614_s27, %s3614_s27 }
  0x45   : > { %p3617_p9 = pnand %p3615_p1, %p3527_p12  ;;  %p3624_p5 = por %p3623_p3, %p3622_p0 }
  0x46   : > { %3386 = dma.hbm_to_vmem [thread:$0]  (!%p3927_p11), %s4716_s4, 2048, %s427_s28, [#allocation6], %s4693_s22, %s4693_s22, %s4694_s25  }
  0x47   : > { %p3618_p13 = pneg %p3617_p9 }
  0x49   : > { %p3625_p10 = pnand %p3624_p5, %p3618_p13 }
  0x4b   : > { %3628 = shalt.err (!%p3625_p10)
}
  0x4c   : > { %s4717_s7 = sld [smem:[#allocation30_spill]]  ;;  %s3978_s20 = sadd.s32 1, %s3785_s16  }
  0x4d   : > { %s69_s24 = sadd.s32 1, %s3781_s15  ;;  %s66_s11 = ssub.s32 %s3785_s16, %s3978_s20 }
  0x4e   : > { %p76_p12 = scmp.ne.s32.totalorder %s3781_s15, %s3777_s30  ;;  %p67_p7 = scmp.eq.s32.totalorder %s66_s11, 0 }
  0x4f   : > { %p77_p1 = scmp.eq.s32.totalorder %s3785_s16, 0  ;;  %p3411_p13 = scmp.lt.s32.totalorder %s3785_s16, 2 }
  0x50   : > { %p3988_p9 = por %p258_p2, %p76_p12  ;;  %s479_s27 = sand.u32 1, %s3781_s15  }
  0x51   : > { %s3994_s23 = scalar_select %p67_p7, %s3781_s15, %s69_s24  }
  0x52   : > { %3392 = dma.hbm_to_vmem [thread:$0]  (!%p3927_p11), %s4717_s7, 2048, %s456_s26, [#allocation9], %s4693_s22, %s4693_s22, %s4694_s25  }
  0x53   : > { %s4718_s29 = scalar_select %p3988_p9, 1, 0 }
  0x54   : > { %4719 = sst [smem:[#allocation22_spill]] %s3994_s23  ;;  %p78_p0 = por %p77_p1, %p76_p12 }
  0x55   : > { %s3039_s28 = sshll.u32 %s479_s27, 6  ;;  %s3074_s26 = sshll.u32 %s3785_s16, 10 }
  0x56   : > { %s4720_s1 = sld [smem:[#allocation24_spill]]  ;;  %s483_s11 = scalar_lea.vmem [#allocation2], %s3039_s28 }
  0x57   : > { %s490_s3 = sshll.u32 %s483_s11, 4  ;;  %p4005_p2 = pnand %p3411_p13, %p78_p0  ;;  %s4003_s3 = int_to_ptr.vmem [resolvable:$true] %s490_s3 }
  0x58   : > { %s4009_s24 = scalar_lea.sflag [#allocation3], %s479_s27 }
  0x59   : > { %p3631_p3 = pneg %p4005_p2 }
  0x5c   : > { %s4001_s25 = scalar_lea.hbm %s4720_s1, %s3074_s26  ;;  %s3634_s28 = scalar_lea.hbm %s4720_s1, 2048 }
  0x5d   : > { %s3629_s6 = scalar_lea.hbm %s4001_s25, 1024  ;;  %p3635_p12 = scmp.lt.s32.totalorder %s4001_s25, %s4720_s1 }
  0x5e   : > { %p3630_p11 = scmp.ne.s32.totalorder %s4001_s25, %s3629_s6  ;;  %p3636_p7 = scmp.lt.s32.totalorder %s3634_s28, %s3629_s6 }
  0x60   : > { %p3632_p5 = pnand %p3631_p3, %p3630_p11  ;;  %p3637_p1 = por %p3636_p7, %p3635_p12 }
  0x62   : > { %p3633_p10 = pneg %p3632_p5 }
  0x64   : > { %p3638_p13 = pnand %p3637_p1, %p3633_p10 }
  0x66   : > { %3641 = shalt.err (!%p3638_p13)
}
  0x67   : > { %s3642_s27 = scalar_lea.vmem %s4003_s3, 1024  ;;  %s3793_s7 = smov [#allocation2]  }
  0x68   : > { %p3643_p0 = scmp.ne.s32.totalorder %s4003_s3, %s3642_s27  ;;  %s3647_s23 = sshll.u32 %s3793_s7, 4  ;;  %s3648_s23 = int_to_ptr.vmem [resolvable:$false] %s3647_s23 }
  0x69   : > { %s3649_s22 = scalar_lea.vmem %s3648_s23, 2048  ;;  %p3650_p5 = scmp.lt.s32.totalorder %s4003_s3, %s3648_s23 }
  0x6a   : > { %p3645_p6 = pnand %p3643_p0, %p3631_p3  ;;  %p3651_p9 = scmp.lt.s32.totalorder %s3649_s22, %s3642_s27 }
  0x6c   : > { %p3646_p11 = pneg %p3645_p6  ;;  %p3652_p4 = por %p3651_p9, %p3650_p5 }
  0x6e   : > { %p3653_p8 = pnand %p3652_p4, %p3646_p11 }
  0x70   : > { %3656 = shalt.err (!%p3653_p8)
}
  0x71   : > { %s4722_s6 = smov 8   ;;  %s4723_s26 = smov 128  }
  0x72   : > { %3396 = dma.hbm_to_vmem [thread:$0]  (!%p4005_p2), %s4001_s25, 1024, %s4003_s3, %s4009_s24, %s4723_s26, %s4723_s26, %s4722_s6  }
  0x73   : > { %p4724_p6 = scmp.ne.s32.totalorder %s4712_s21, 0 }
  0x74   : > { %s4036_s7 = sand.u32 (!%p4724_p6), 1, %s3777_s30   ;;  %p4725_p4 = scmp.ne.s32.totalorder (!%p4724_p6), %s4709_s19, 0 }
  0x75   : > { %509 = sbr.rel (%p4724_p6) target bundleno = 2236 (0x8bc), region = 56  ;;  %s3043_s23 = sshll.u32 (!%p4724_p6), %s4036_s7, 6 }
  0x76   : > { %s512_s28 = scalar_lea.sflag (!%p4724_p6), [#allocation3], %s4036_s7  ;;  %s4040_s18 = scalar_lea.vmem (!%p4724_p6), [#allocation2], %s3043_s23 }
  0x7a   : > { %3752 = dma.done.wait (%p4725_p4), %s512_s28, 1024  }
  0x7b   : > { %3754 = vsyncadd (%p4725_p4), %s512_s28, 4294966272  ;;  %p4726_p8 = scmp.eq.s32.totalorder %s3897_s17, 0 }
  0x7d   : > { %3756 = dma.done.wait (%p4726_p8), [#allocation6], 4096   ;;  %p4727_p9 = pmov %p4726_p8 }
  0x7e   : > { %p4728_p2 = pmov %p4726_p8 }
  0x7f   : > { %3758 = vsyncadd (%p4727_p9), [#allocation6], 4294963200 }
  0x80   : > { %3760 = dma.done.wait (%p4728_p2), [#allocation9], 4096   ;;  %p4729_p3 = pmov %p4728_p2 }
  0x81   : > { %v3794_v0 = vmov 0.0   ;;  %vm3795_vm0 = vmmov 0   ;;  %v652_v1 = vld [vmem:[#allocation5 + $0x78] sm:$0xff]  ;;  %v651_v3 = vld [vmem:[#allocation5 + $0x70] sm:$0xff]  ;;  %v650_v5 = vld [vmem:[#allocation5 + $0x68] sm:$0xff]  ;;  %p606_p10 = scmp.lt.s32.totalorder %s3897_s17, 1  ;;  %v883_v44 = vlaneseq }
  0x82   : > { %3762 = vsyncadd (%p4729_p3), [#allocation9], 4294963200  ;;  %3167 = vmatprep.subr.mxu0 %v3794_v0  ;;  %3199 = vmatprep.mubr.msk.f32.mxu0 %vm3795_vm0, %v3794_v0  ;;  %v668_v2 = vld [vmem:[#allocation7 + $0x78] sm:$0xff]  ;;  %v667_v4 = vld [vmem:[#allocation7 + $0x70] sm:$0xff]  ;;  %s4730_s0 = sld [smem:[#allocation23_spill]]  ;;  %vm1056_vm1 = vcmask 1041409  }
  0x83   : > { %3168 = vmatpush3.msra.mxu0 %v652_v1  ;;  %3202 = vmatprep.subr.mxu1 %v668_v2  ;;  %v666_v6 = vld [vmem:[#allocation7 + $0x68] sm:$0xff]  ;;  %v649_v7 = vld [vmem:[#allocation5 + $0x60] sm:$0xff]  ;;  %v648_v9 = vld [vmem:[#allocation5 + $0x58] sm:$0xff]  ;;  %s607_s3 = scalar_select %p606_p10, %s3897_s17, 1  ;;  %v3796_v42 = vmov 1966171168  }
  0x84   : > { %3169 = vmatprep.subr.mxu0 %v3794_v0  ;;  %3203 = vmatpush3.msra.mxu1 %v668_v2  ;;  %v665_v8 = vld [vmem:[#allocation7 + $0x60] sm:$0xff]  ;;  %v664_v10 = vld [vmem:[#allocation7 + $0x58] sm:$0xff]  ;;  %v647_v11 = vld [vmem:[#allocation5 + $0x50] sm:$0xff]  ;;  %v881_v43 = vunpack.c.l.s4 %v3796_v42  ;;  %v4115_v46 = vshrl.u32 %v883_v44, 7  ;;  %s4731_s5 = sld [smem:[#allocation28_spill]]  ;;  %vm1058_vm2 = vcmask 1042434  }
  0x85   : > { %3170 = vmatpush3.msra.mxu0 %v651_v3  ;;  %3204 = vmatprep.subr.mxu1 %v667_v4  ;;  %v663_v12 = vld [vmem:[#allocation7 + $0x50] sm:$0xff]  ;;  %v646_v13 = vld [vmem:[#allocation5 + $0x48] sm:$0xff]  ;;  %v645_v15 = vld [vmem:[#allocation5 + $0x40] sm:$0xff]  ;;  %s4070_s4 = sshll.u32 %s607_s3, 3  ;;  %vm1060_vm3 = vcmask 1043459   ;;  %vm1062_vm4 = vcmask 1044484  }
  0x86   : > { %3171 = vmatprep.subr.mxu0 %v3794_v0  ;;  %3205 = vmatpush3.msra.mxu1 %v667_v4  ;;  %v662_v14 = vld [vmem:[#allocation7 + $0x48] sm:$0xff]  ;;  %v661_v16 = vld [vmem:[#allocation7 + $0x40] sm:$0xff]  ;;  %v644_v17 = vld [vmem:[#allocation5 + $0x38] sm:$0xff]  ;;  %v882_v45 = vunpack.c.0.s8 %v881_v43  ;;  %v4119_v51 = vsub.s32 0, %v4115_v46  ;;  %vm1064_vm5 = vcmask 1045509   ;;  %vm1066_vm6 = vcmask 1046534   ;;  %s618_s28 = scalar_lea.vmem %s4685_s12, %s4070_s4  ;;  %s626_s21 = scalar_lea.vmem %s4687_s14, %s4070_s4 }
  0x87   : > { %3172 = vmatpush3.msra.mxu0 %v650_v5  ;;  %3206 = vmatprep.subr.mxu1 %v666_v6  ;;  %v660_v18 = vld [vmem:[#allocation7 + $0x38] sm:$0xff]  ;;  %v643_v19 = vld [vmem:[#allocation5 + $0x30] sm:$0xff]  ;;  %v642_v21 = vld [vmem:[#allocation5 + $0x28] sm:$0xff]  ;;  %vm1068_vm7 = vcmask 1047559   ;;  %vm1071_vm8 = vcmask 64512   ;;  %s4732_s2 = sld [smem:[#allocation25_spill]]  ;;  %s622_s11 = scalar_lea.vmem %s4686_s13, %s4070_s4 }
  0x88   : > { %3173 = vmatprep.subr.mxu0 %v3794_v0  ;;  %3207 = vmatpush3.msra.mxu1 %v666_v6  ;;  %v659_v20 = vld [vmem:[#allocation7 + $0x30] sm:$0xff]  ;;  %v658_v22 = vld [vmem:[#allocation7 + $0x28] sm:$0xff]  ;;  %v641_v23 = vld [vmem:[#allocation5 + $0x20] sm:$0xff]  ;;  %s4078_s25 = scalar_lea.vmem %s4730_s0, %s4070_s4  ;;  %v885_v47 = vsub.s32 %v882_v45, %v4115_v46  ;;  %vm1814_vm9 = vcmask 1040384   ;;  %s3069_s26 = sshll.u32 %s3897_s17, 7 }
  0x89   : > { %3174 = vmatpush3.msra.mxu0 %v649_v7  ;;  %3208 = vmatprep.subr.mxu1 %v665_v8  ;;  %v657_v24 = vld [vmem:[#allocation7 + $0x20] sm:$0xff]  ;;  %v640_v25 = vld [vmem:[#allocation5 + $0x18] sm:$0xff]  ;;  %v639_v27 = vld [vmem:[#allocation5 + $0x10] sm:$0xff]  ;;  %s4575_s22 = scalar_lea.hbm %s4683_s10, %s3069_s26  ;;  %s4733_s0 = sld [smem:[#allocation31_spill]] }
  0x8a   : > { %3175 = vmatprep.subr.mxu0 %v3794_v0  ;;  %3209 = vmatpush3.msra.mxu1 %v665_v8  ;;  %v656_v26 = vld [vmem:[#allocation7 + $0x18] sm:$0xff]  ;;  %v655_v28 = vld [vmem:[#allocation7 + $0x10] sm:$0xff]  ;;  %v638_v29 = vld [vmem:[#allocation5 + $0x8] sm:$0xff]  ;;  %s2697_s24 = scalar_lea.sflag [#allocation4], %s4036_s7  ;;  %p4734_p7 = scmp.ne.s32.totalorder %s4718_s29, 0 }
  0x8b   : > { %3176 = vmatpush3.msra.mxu0 %v648_v9  ;;  %3210 = vmatprep.subr.mxu1 %v664_v10  ;;  %v654_v30 = vld [vmem:[#allocation7 + $0x8] sm:$0xff]  ;;  %v637_v31 = vld [vmem:[#allocation5] sm:$0xff]  ;;  %v4088_v36 = vld [vmem:[%s4040_s18 + $0x10] sm:$0xff] }
  0x8c   : > { %3177 = vmatprep.subr.mxu0 %v3794_v0  ;;  %3211 = vmatpush3.msra.mxu1 %v664_v10  ;;  %v653_v32 = vld [vmem:[#allocation7] sm:$0xff]  ;;  %v4085_v35 = vld [vmem:[%s4040_s18 + $0x8] sm:$0xff]  ;;  %v4094_v37 = vld [vmem:[%s4040_s18 + $0x18] sm:$0xff] }
  0x8d   : > { %3178 = vmatpush3.msra.mxu0 %v647_v11  ;;  %3212 = vmatprep.subr.mxu1 %v663_v12  ;;  %v627_v33 = vld [vmem:[%s4078_s25] sm:$0xff]  ;;  %v4104_v39 = vld [vmem:[%s4040_s18 + $0x28] sm:$0xff]  ;;  %v4107_v40 = vld [vmem:[%s4040_s18 + $0x30] sm:$0xff]  ;;  %s614_s6 = scalar_lea.vmem %s4732_s2, %s4070_s4  ;;  %s4544_s4 = sshll.u32 %s4036_s7, 3 }
  0x8e   : > { %3179 = vmatprep.subr.mxu0 %v3794_v0  ;;  %3213 = vmatpush3.msra.mxu1 %v663_v12  ;;  %v628_v34 = vld [vmem:[%s4040_s18] sm:$0xff]  ;;  %v635_v41 = vld [vmem:[%s4040_s18 + $0x38] sm:$0xff]  ;;  %s573_s23 = scalar_lea.vmem [#allocation11], %s4544_s4  ;;  %s4698_s19 = scalar_lea.vmem [#allocation12], %s4544_s4 }
  0x8f   : > { %3180 = vmatpush3.msra.mxu0 %v646_v13  ;;  %3214 = vmatprep.subr.mxu1 %v662_v14  ;;  %v632_v38 = vld [vmem:[%s4040_s18 + $0x20] sm:$0xff]  ;;  %s3798_s2 = smov [#allocation11]  }
  0x90   : > { %3181 = vmatprep.subr.mxu0 %v3794_v0  ;;  %3215 = vmatpush3.msra.mxu1 %v662_v14 }
  0x91   : > { %3182 = vmatpush3.msra.mxu0 %v645_v15  ;;  %3216 = vmatprep.subr.mxu1 %v661_v16 }
  0x92   : > { %3183 = vmatprep.subr.mxu0 %v3794_v0  ;;  %3217 = vmatpush3.msra.mxu1 %v661_v16 }
  0x93   : > { %3184 = vmatpush3.msra.mxu0 %v644_v17  ;;  %3218 = vmatprep.subr.mxu1 %v660_v18 }
  0x94   : > { %3185 = vmatprep.subr.mxu0 %v3794_v0  ;;  %3219 = vmatpush3.msra.mxu1 %v660_v18 }
  0x95   : > { %3186 = vmatpush3.msra.mxu0 %v643_v19  ;;  %3220 = vmatprep.subr.mxu1 %v659_v20 }
  0x96   : > { %3187 = vmatprep.subr.mxu0 %v3794_v0  ;;  %3221 = vmatpush3.msra.mxu1 %v659_v20 }
  0x97   : > { %3188 = vmatpush3.msra.mxu0 %v642_v21  ;;  %3222 = vmatprep.subr.mxu1 %v658_v22 }
  0x98   : > { %3189 = vmatprep.subr.mxu0 %v3794_v0  ;;  %3223 = vmatpush3.msra.mxu1 %v658_v22 }
  0x99   : > { %3190 = vmatpush3.msra.mxu0 %v641_v23  ;;  %3224 = vmatprep.subr.mxu1 %v657_v24 }
  0x9a   : > { %3191 = vmatprep.subr.mxu0 %v3794_v0  ;;  %3225 = vmatpush3.msra.mxu1 %v657_v24 }
  0x9b   : > { %3192 = vmatpush3.msra.mxu0 %v640_v25  ;;  %3226 = vmatprep.subr.mxu1 %v656_v26  ;;  %v3056_v25 = vld [vmem:[%s4731_s5] ss:$0 sm:$0xff]  ;;  %s3661_s5 = sshll.u32 %s3798_s2, 4  ;;  %s3662_s5 = int_to_ptr.vmem [resolvable:$false] %s3661_s5 }
  0x9c   : > { %3193 = vmatprep.subr.mxu0 %v3794_v0  ;;  %3227 = vmatpush3.msra.mxu1 %v656_v26 }
  0x9d   : > { %3194 = vmatpush3.msra.mxu0 %v639_v27  ;;  %3228 = vmatprep.subr.mxu1 %v655_v28 }
  0x9e   : > { %3195 = vmatprep.subr.mxu0 %v3794_v0  ;;  %3229 = vmatpush3.msra.mxu1 %v655_v28 }
  0x9f   : > { %3196 = vmatpush3.msra.mxu0 %v638_v29  ;;  %3230 = vmatprep.subr.mxu1 %v654_v30 }
  0xa0   : > { %3197 = vmatprep.subr.mxu0 %v3794_v0  ;;  %3231 = vmatpush3.msra.mxu1 %v654_v30 }
  0xa1   : > { %3198 = vmatpush3.msra.mxu0 %v637_v31  ;;  %3232 = vmatprep.subr.mxu1 %v653_v32 }
  0xa2   : > { %3200 = vmatmul.mubr.f32.vlgmr.msra.gmra.mxu0 %v627_v33  ;;  %3233 = vmatpush3.msra.mxu1 %v653_v32 }
  0xa3   : > { %3234 = vmatprep.mubr.f32.mxu1 %v628_v34  ;;  %3246 = vmatprep.subr.mxu0 %v3794_v0 }
  0xa4   : > { %3235 = vmatmul.mubr.f32.vlgmr.msra.gmra.mxu1 %v4085_v35  ;;  %3247 = vmatpush3.msra.mxu0 %v628_v34 }
  0xa5   : > { %3237 = vmatprep.mubr.f32.mxu1 %v4088_v36  ;;  %3266 = vmatprep.subr.mxu1 %v3794_v0 }
  0xa6   : > { %3248 = vmatprep.mubr.msk.f32.mxu0 %vm3795_vm0, %v3794_v0  ;;  %3251 = vmatprep.subr.mxu0 %v3794_v0 }
  0xa7   : > { %3267 = vmatpush3.msra.mxu1 %v632_v38 }
  0xa8   : > { %3238 = vmatmul.mubr.f32.gmra.mxu1 %v4094_v37  ;;  %3276 = vmatprep.subr.mxu1 %v3794_v0 }
  0xa9   : > { %3240 = vmatprep.mubr.f32.mxu1 %v632_v38 }
  0xac   : > { %3241 = vmatmul.mubr.f32.gmra.mxu1 %v4104_v39 }
  0xad   : > { %3243 = vmatprep.mubr.f32.mxu1 %v4107_v40 }
  0xb0   : > { %3244 = vmatmul.mubr.f32.gmra.mxu1 %v635_v41 }
  0xb1   : > { %3268 = vmatprep.mubr.msk.f32.mxu1 %vm3795_vm0, %v3794_v0 }
 0x162   : > { %v769_v48 = vpop.f32.mrf.mxu0 }
 0x163   : > { %v879_v49 = vcombine.high %v769_v48, %v769_v48  ;;  %v886_v50 = vrot.slane %v769_v48, %v885_v47 }
 0x164   : > { %v3236_v52 = vpop.f32.mrf.mxu1  ;;  %v3201_v53 = vpop.f32.mrf.mxu0 }
 0x165   : > { %v893_v54 = vrot.slane %v879_v49, %v885_v47  ;;  %v894_v55 = vcombine.high %v886_v50, %v886_v50  ;;  %v902_v56 = vrot.slane %v886_v50, %v885_v47  ;;  %v1023_v49 = vand.u32 127, %v883_v44 }
 0x166   : > { %v839_v57 = vpop.f32.mrf.mxu1 }
 0x167   : > { %v895_v58 = vcombine.high %v893_v54, %v893_v54  ;;  %v916_v59 = vrot.slane %v894_v55, %v885_v47  ;;  %v931_v60 = vrot.slane %v902_v56, %v4119_v51  ;;  %v924_v61 = vcombine.high %v902_v56, %v902_v56 }
 0x168   : > { %v3239_v62 = vpop.f32.mrf.mxu1  ;;  %v909_v63 = vrot.slane %v893_v54, %v885_v47 }
 0x169   : > { %v935_v1 = vrot.slane %v916_v59, %v4119_v51  ;;  %v968_v2 = vadd.f32 %v931_v60, %v839_v57  ;;  %v926_v3 = vcombine.high %v916_v59, %v916_v59  ;;  %v939_v4 = vrot.slane %v924_v61, %v4119_v51 }
 0x16a   : > { %v849_v5 = vpop.f32.mrf.mxu1  ;;  %v923_v6 = vrot.slane %v895_v58, %v885_v47  ;;  %v947_v14 = vrot.slane %v909_v63, %v4119_v51  ;;  %v925_v15 = vcombine.high %v909_v63, %v909_v63 }
 0x16b   : > { %v969_v7 = vadd.f32 %v3236_v52, %v935_v1  ;;  %3461 = vtanh.f32 %v968_v2  ;;  %v943_v8 = vrot.slane %v926_v3, %v4119_v51  ;;  %v970_v9 = vadd.f32 %v939_v4, %v849_v5 }
 0x16c   : > { %v3242_v10 = vpop.f32.mrf.mxu1  ;;  %v951_v11 = vrot.slane %v923_v6, %v4119_v51  ;;  %v927_v12 = vcombine.high %v923_v6, %v923_v6  ;;  %v955_v21 = vrot.slane %v925_v15, %v4119_v51  ;;  %v4134_v52 = vsub.s32 %v1023_v49, %v4115_v46 }
 0x16d   : > { %3463 = vtanh.f32 %v969_v7  ;;  %v971_v13 = vadd.f32 %v3239_v62, %v943_v8  ;;  %v4157_v15 = vsub.s32 1, %v4115_v46 }
 0x16e   : > { %3465 = vtanh.f32 %v970_v9  ;;  %v859_v16 = vpop.f32.mrf.mxu1  ;;  %v973_v18 = vadd.f32 %v3242_v10, %v951_v11  ;;  %v959_v20 = vrot.slane %v927_v12, %v4119_v51  ;;  %v3797_v12 = vmov 0  }
 0x16f   : > { %v972_v17 = vadd.f32 %v947_v14, %v859_v16  ;;  %3467 = vtanh.f32 %v971_v13  ;;  %3460 = vset.pattern.permute.xlu0 %v3797_v12  ;;  %3459 = vset.pattern.permute.xlu1 %v3797_v12  ;;  %v636_v13 = vld [vmem:[%s614_s6] sm:$0xff]  ;;  %v4160_v16 = vsub.s32 2, %v4115_v46 }
 0x170   : > { %v3245_v19 = vpop.f32.mrf.mxu1  ;;  %v1316_v14 = vadd.f32 1e-20, %v636_v13 }
 0x171   : > { %3469 = vtanh.f32 %v972_v17  ;;  %v975_v24 = vadd.f32 %v3245_v19, %v959_v20  ;;  %v4163_v17 = vsub.s32 3, %v4115_v46 }
 0x172   : > { %v869_v22 = vpop.f32.mrf.mxu1  ;;  %3471 = vtanh.f32 %v973_v18 }
 0x173   : > { %v974_v23 = vadd.f32 %v955_v21, %v869_v22  ;;  %v4169_v22 = vsub.s32 4, %v4115_v46 }
 0x175   : > { %3473 = vtanh.f32 %v974_v23 }
 0x176   : > { %3475 = vtanh.f32 %v975_v24 }
 0x177   : > { %3477 = vlog2.f32 %v1316_v14 }
 0x178   : > { %v3462_v26 = vpop.eup %3461 }
 0x179   : > { %v990_v27 = vmul.f32 %v3462_v26, %v3056_v25 }
 0x17a   : > { %v3464_v28 = vpop.eup %3463 }
 0x17b   : > { %v3466_v29 = vpop.eup %3465  ;;  %998 = vadd.xlane.f32.xlu0 %v990_v27  ;;  %v991_v32 = vmul.f32 %v3464_v28, %v3056_v25 }
 0x17c   : > { %v992_v30 = vmul.f32 %v3466_v29, %v3056_v25  ;;  %v3468_v31 = vpop.eup %3467 }
 0x17d   : > { %v993_v34 = vmul.f32 %v3468_v31, %v3056_v25 }
 0x17e   : > { %v3470_v33 = vpop.eup %3469  ;;  %1002 = vadd.xlane.f32.xlu1 %v992_v30  ;;  %v4181_v30 = vsub.s32 5, %v4115_v46 }
 0x17f   : > { %1000 = vadd.xlane.f32.xlu0 %v991_v32  ;;  %v3472_v38 = vpop.eup %3471  ;;  %v994_v41 = vmul.f32 %v3470_v33, %v3056_v25 }
 0x180   : > { %v995_v43 = vmul.f32 %v3472_v38, %v3056_v25  ;;  %v4188_v38 = vsub.s32 6, %v4115_v46 }
 0x182   : > { %v3474_v42 = vpop.eup %3473  ;;  %1004 = vadd.xlane.f32.xlu1 %v993_v34 }
 0x183   : > { %1006 = vadd.xlane.f32.xlu0 %v994_v41  ;;  %v3476_v45 = vpop.eup %3475  ;;  %v996_v47 = vmul.f32 %v3474_v42, %v3056_v25 }
 0x184   : > { %v997_v48 = vmul.f32 %v3476_v45, %v3056_v25  ;;  %v3478_v29 = vpop.eup %3477 }
 0x185   : > { %v1318_v34 = vmul.f32 0.6931472, %v3478_v29 }
 0x186   : > { %1008 = vadd.xlane.f32.xlu1 %v995_v43 }
 0x187   : > { %1010 = vadd.xlane.f32.xlu0 %v996_v47  ;;  %v1319_v45 = vsub.f32 0.0, %v1318_v34  ;;  %v4195_v47 = vsub.s32 7, %v4115_v46 }
 0x18a   : > { %1012 = vadd.xlane.f32.xlu1 %v997_v48 }
 0x204   : > { %v999_v50 = vpop.xlane.xlu0 %998 }
 0x205   : > { %v1027_v55 = vrot.slane %v999_v50, %v4134_v52 }
 0x207   : > { %v1003_v53 = vpop.xlane.xlu1 %1002 }
 0x208   : > { %v1001_v54 = vpop.xlane.xlu0 %1000  ;;  %v1035_v57 = vrot.slane %v1003_v53, %v4134_v52 }
 0x209   : > { %v1031_v56 = vrot.slane %v1001_v54, %v4134_v52 }
 0x20b   : > { %v1057_v58 = vsel %vm1056_vm1, %v1031_v56, %v1027_v55  ;;  %v1005_v59 = vpop.xlane.xlu1 %1004 }
 0x20c   : > { %v1059_v44 = vsel %vm1058_vm2, %v1035_v57, %v1057_v58  ;;  %v1039_v60 = vrot.slane %v1005_v59, %v4134_v52  ;;  %v1007_v61 = vpop.xlane.xlu0 %1006 }
 0x20d   : > { %v1043_v62 = vrot.slane %v1007_v61, %v4134_v52 }
 0x20e   : > { %v1061_v63 = vsel %vm1060_vm3, %v1039_v60, %v1059_v44 }
 0x20f   : > { %v1063_v1 = vsel %vm1062_vm4, %v1043_v62, %v1061_v63  ;;  %v1009_v2 = vpop.xlane.xlu1 %1008 }
 0x210   : > { %v1047_v3 = vrot.slane %v1009_v2, %v4134_v52  ;;  %v1011_v4 = vpop.xlane.xlu0 %1010 }
 0x211   : > { %v1051_v5 = vrot.slane %v1011_v4, %v4134_v52 }
 0x212   : > { %v1065_v6 = vsel %vm1064_vm5, %v1047_v3, %v1063_v1 }
 0x213   : > { %v1013_v7 = vpop.xlane.xlu1 %1012  ;;  %v1067_v8 = vsel %vm1066_vm6, %v1051_v5, %v1065_v6 }
 0x214   : > { %v1055_v9 = vrot.slane %v1013_v7, %v4134_v52 }
 0x216   : > { %v1069_v10 = vsel %vm1068_vm7, %v1055_v9, %v1067_v8 }
 0x217   : > { %v1072_v11 = vsel %vm1071_vm8, %v1069_v10, -inf }
 0x218   : > { %1073 = vmax.xlane.f32.xlu0 %v1072_v11 }
 0x2a1   : > { %v1074_v18 = vpop.xlane.xlu0 %1073 }
 0x2a2   : > { %v1079_v19 = vrot.slane %v1074_v18, %v4119_v51  ;;  %v1083_v20 = vrot.slane %v1074_v18, %v4157_v15  ;;  %v1087_v21 = vrot.slane %v1074_v18, %v4160_v16  ;;  %v1091_v23 = vrot.slane %v1074_v18, %v4163_v17 }
 0x2a3   : > { %v1095_v31 = vrot.slane %v1074_v18, %v4169_v22  ;;  %v1099_v41 = vrot.slane %v1074_v18, %v4181_v30  ;;  %v1103_v48 = vrot.slane %v1074_v18, %v4188_v38 }
 0x2a4   : > { %v4172_v24 = vsub.f32 %v999_v50, %v1079_v19  ;;  %v4174_v25 = vsub.f32 %v1001_v54, %v1083_v20  ;;  %v4176_v26 = vsub.f32 %v1003_v53, %v1087_v21  ;;  %v4184_v32 = vsub.f32 %v1005_v59, %v1091_v23 }
 0x2a5   : > { %v4191_v42 = vsub.f32 %v1007_v61, %v1095_v31  ;;  %v4198_v49 = vsub.f32 %v1009_v2, %v1099_v41  ;;  %v1320_v53 = vadd.f32 1e-20, %v1319_v45  ;;  %v1107_v54 = vrot.slane %v1074_v18, %v4195_v47 }
 0x2a6   : > { %v1124_v27 = vmul.f32 1.442695, %v4172_v24  ;;  %v1126_v28 = vmul.f32 1.442695, %v4174_v25  ;;  %v1128_v33 = vmul.f32 1.442695, %v4176_v26  ;;  %v4202_v55 = vsub.f32 %v1011_v4, %v1103_v48 }
 0x2a7   : > { %v1130_v43 = vmul.f32 1.442695, %v4184_v32  ;;  %v1132_v50 = vmul.f32 1.442695, %v4191_v42  ;;  %v1134_v56 = vmul.f32 1.442695, %v4198_v49  ;;  %v4211_v46 = vsub.f32 %v1013_v7, %v1107_v54 }
 0x2a8   : > { %3479 = vpow2.f32 %v1124_v27  ;;  %v1136_v59 = vmul.f32 1.442695, %v4202_v55 }
 0x2a9   : > { %3481 = vpow2.f32 %v1126_v28  ;;  %v1138_v60 = vmul.f32 1.442695, %v4211_v46 }
 0x2aa   : > { %3483 = vpow2.f32 %v1128_v33 }
 0x2ab   : > { %3485 = vpow2.f32 %v1130_v43 }
 0x2ac   : > { %3487 = vpow2.f32 %v1132_v50 }
 0x2ad   : > { %3489 = vlog2.f32 %v1320_v53 }
 0x2ae   : > { %3491 = vpow2.f32 %v1134_v56 }
 0x2af   : > { %3493 = vpow2.f32 %v1136_v59 }
 0x2b0   : > { %3495 = vpow2.f32 %v1138_v60 }
 0x2b5   : > { %v4205_v57 = vpop.eup %3479 }
 0x2b6   : > { %v4207_v58 = vpop.eup %3481  ;;  %1149 = vperm.xlu1 %3459, %v4205_v57  }
 0x2b7   : > { %1152 = vperm.xlu0 %3460, %v4207_v58   ;;  %v4214_v44 = vpop.eup %3483 }
 0x2b8   : > { %v4218_v61 = vpop.eup %3485 }
 0x2b9   : > { %v4221_v62 = vpop.eup %3487 }
 0x2ba   : > { %1155 = vperm.xlu1 %3459, %v4214_v44   ;;  %v3490_v63 = vpop.eup %3489 }
 0x2bb   : > { %v4224_v1 = vpop.eup %3491  ;;  %v1322_v2 = vmul.f32 0.6931472, %v3490_v63 }
 0x2bc   : > { %v4227_v3 = vpop.eup %3493 }
 0x2bd   : > { %v1323_v4 = vsub.f32 0.0, %v1322_v2  ;;  %v4230_v5 = vpop.eup %3495 }
 0x2be   : > { %1158 = vperm.xlu1 %3459, %v4218_v61  }
 0x2bf   : > { %v1328_v6 = vrot.slane %v1323_v4, %v4119_v51  ;;  %v1335_v7 = vrot.slane %v1323_v4, %v4157_v15  ;;  %v1342_v8 = vrot.slane %v1323_v4, %v4160_v16  ;;  %v1349_v9 = vrot.slane %v1323_v4, %v4163_v17 }
 0x2c0   : > { %v1356_v10 = vrot.slane %v1323_v4, %v4169_v22  ;;  %v1363_v11 = vrot.slane %v1323_v4, %v4181_v30  ;;  %v1370_v12 = vrot.slane %v1323_v4, %v4188_v38  ;;  %v1377_v13 = vrot.slane %v1323_v4, %v4195_v47 }
 0x2c1   : > { %1330 = vbcast.lane.b32.xlu0 %v1328_v6, 256 }
 0x2c2   : > { %1161 = vperm.xlu1 %3459, %v4221_v62  }
 0x2c5   : > { %1337 = vbcast.lane.b32.xlu0 %v1335_v7, 256 }
 0x2c6   : > { %1164 = vperm.xlu1 %3459, %v4224_v1  }
 0x2c9   : > { %1344 = vbcast.lane.b32.xlu0 %v1342_v8, 256 }
 0x2ca   : > { %1167 = vperm.xlu1 %3459, %v4227_v3  }
 0x2cd   : > { %1351 = vbcast.lane.b32.xlu0 %v1349_v9, 256 }
 0x2ce   : > { %1170 = vperm.xlu1 %3459, %v4230_v5  }
 0x2d1   : > { %1358 = vbcast.lane.b32.xlu0 %v1356_v10, 256 }
 0x2d5   : > { %1365 = vbcast.lane.b32.xlu0 %v1363_v11, 256 }
 0x2d9   : > { %1372 = vbcast.lane.b32.xlu0 %v1370_v12, 256 }
 0x2dd   : > { %1379 = vbcast.lane.b32.xlu0 %v1377_v13, 256 }
 0x331   : > { %v1150_v14 = vpop.permute.xlu1 %1149 }
 0x332   : > { %v1153_v21 = vpop.permute.xlu0 %1152  ;;  %v1175_v28 = vrot.slane %v1150_v14, %v4134_v52 }
 0x333   : > { %v1179_v27 = vrot.slane %v1153_v21, %v4134_v52 }
 0x335   : > { %v1156_v18 = vpop.permute.xlu1 %1155  ;;  %v1204_v41 = vsel %vm1056_vm1, %v1179_v27, %v1175_v28 }
 0x336   : > { %v1183_v29 = vrot.slane %v1156_v18, %v4134_v52  ;;  %v1331_v4 = vpop.permute.xlu0 %1330 }
 0x338   : > { %v1205_v45 = vsel %vm1058_vm2, %v1183_v29, %v1204_v41 }
 0x339   : > { %v1159_v19 = vpop.permute.xlu1 %1158 }
 0x33a   : > { %v1187_v31 = vrot.slane %v1159_v19, %v4134_v52  ;;  %v1338_v6 = vpop.permute.xlu0 %1337 }
 0x33c   : > { %v1206_v50 = vsel %vm1060_vm3, %v1187_v31, %v1205_v45 }
 0x33d   : > { %v1162_v20 = vpop.permute.xlu1 %1161 }
 0x33e   : > { %v1191_v33 = vrot.slane %v1162_v20, %v4134_v52  ;;  %v1345_v7 = vpop.permute.xlu0 %1344 }
 0x340   : > { %v1207_v53 = vsel %vm1062_vm4, %v1191_v33, %v1206_v50 }
 0x341   : > { %v1165_v23 = vpop.permute.xlu1 %1164 }
 0x342   : > { %v1195_v43 = vrot.slane %v1165_v23, %v4134_v52  ;;  %v1352_v9 = vpop.permute.xlu0 %1351 }
 0x344   : > { %v1208_v56 = vsel %vm1064_vm5, %v1195_v43, %v1207_v53 }
 0x345   : > { %v1168_v34 = vpop.permute.xlu1 %1167 }
 0x346   : > { %v1199_v48 = vrot.slane %v1168_v34, %v4134_v52  ;;  %v1359_v10 = vpop.permute.xlu0 %1358 }
 0x348   : > { %v1209_v60 = vsel %vm1066_vm6, %v1199_v48, %v1208_v56 }
 0x349   : > { %v1171_v54 = vpop.permute.xlu1 %1170 }
 0x34a   : > { %v1203_v59 = vrot.slane %v1171_v54, %v4134_v52  ;;  %v1366_v12 = vpop.permute.xlu0 %1365 }
 0x34c   : > { %v1210_v63 = vsel %vm1068_vm7, %v1203_v59, %v1209_v60 }
 0x34d   : > { %v1212_v2 = vsel %vm1071_vm8, %v1210_v63, 0.0 }
 0x34e   : > { %1213 = vadd.xlane.f32.xlu1 %v1212_v2  ;;  %v1373_v23 = vpop.permute.xlu0 %1372 }
 0x352   : > { %v1380_v50 = vpop.permute.xlu0 %1379 }
 0x3d7   : > { %v4257_v8 = vpop.xlane.xlu1 %1213 }
 0x3d8   : > { %3497 = vlog2.f32 %v4257_v8 }
 0x3e5   : > { %v3498_v11 = vpop.eup %3497 }
 0x3e6   : > { %v1216_v13 = vmul.f32 0.6931472, %v3498_v11 }
 0x3e8   : > { %v1241_v14 = vrot.slane %v1216_v13, %v4181_v30  ;;  %v1225_v18 = vrot.slane %v1216_v13, %v4157_v15  ;;  %v1221_v19 = vrot.slane %v1216_v13, %v4119_v51  ;;  %v1229_v20 = vrot.slane %v1216_v13, %v4160_v16 }
 0x3e9   : > { %v1233_v21 = vrot.slane %v1216_v13, %v4163_v17  ;;  %v1249_v33 = vrot.slane %v1216_v13, %v4195_v47 }
 0x3ea   : > { %v4266_v27 = vsub.f32 %v4174_v25, %v1225_v18  ;;  %v4269_v28 = vsub.f32 %v4172_v24, %v1221_v19  ;;  %v4272_v29 = vsub.f32 %v4176_v26, %v1229_v20  ;;  %v4275_v31 = vsub.f32 %v4198_v49, %v1241_v14 }
 0x3eb   : > { %v4281_v43 = vsub.f32 %v4184_v32, %v1233_v21  ;;  %v1237_v25 = vrot.slane %v1216_v13, %v4169_v22  ;;  %v4287_v48 = vsub.f32 %v4211_v46, %v1249_v33  ;;  %v1245_v32 = vrot.slane %v1216_v13, %v4188_v38 }
 0x3ec   : > { %v1390_v34 = vadd.f32 %v1338_v6, %v4266_v27  ;;  %v1389_v41 = vadd.f32 %v1331_v4, %v4269_v28  ;;  %v1391_v24 = vadd.f32 %v1345_v7, %v4272_v29  ;;  %v1394_v26 = vadd.f32 %v1366_v12, %v4275_v31 }
 0x3ed   : > { %v1392_v53 = vadd.f32 %v1352_v9, %v4281_v43  ;;  %v4291_v54 = vsub.f32 %v4191_v42, %v1237_v25  ;;  %v1396_v60 = vadd.f32 %v1380_v50, %v4287_v48  ;;  %v4297_v2 = vsub.f32 %v4202_v55, %v1245_v32 }
 0x3ee   : > { %v1398_v45 = vmul.f32 1.3333334, %v1390_v34  ;;  %v1397_v49 = vmul.f32 1.3333334, %v1389_v41  ;;  %v1399_v56 = vmul.f32 1.3333334, %v1391_v24 }
 0x3ef   : > { %v1402_v59 = vmul.f32 1.3333334, %v1394_v26  ;;  %v1400_v63 = vmul.f32 1.3333334, %v1392_v53  ;;  %v1393_v46 = vadd.f32 %v1359_v10, %v4291_v54  ;;  %v4299_v4 = vmul.f32 1.3333334, %v1396_v60 }
 0x3f0   : > { %1417 = vperm.xlu0 %3460, %v1398_v45   ;;  %1414 = vperm.xlu1 %3459, %v1397_v49   ;;  %v1395_v6 = vadd.f32 %v1373_v23, %v4297_v2 }
 0x3f1   : > { %v1401_v42 = vmul.f32 1.3333334, %v1393_v46 }
 0x3f2   : > { %v1403_v7 = vmul.f32 1.3333334, %v1395_v6 }
 0x3f4   : > { %1420 = vperm.xlu0 %3460, %v1399_v56   ;;  %1429 = vperm.xlu1 %3459, %v1402_v59  }
 0x3f8   : > { %1423 = vperm.xlu0 %3460, %v1400_v63   ;;  %1435 = vperm.xlu1 %3459, %v4299_v4  }
 0x3fc   : > { %1426 = vperm.xlu0 %3460, %v1401_v42  }
 0x400   : > { %1432 = vperm.xlu0 %3460, %v1403_v7  }
 0x46b   : > { %v1418_v9 = vpop.permute.xlu0 %1417  ;;  %v1415_v11 = vpop.permute.xlu1 %1414 }
 0x46c   : > { %v1444_v13 = vrot.slane %v1418_v9, %v4134_v52  ;;  %v1440_v10 = vrot.slane %v1415_v11, %v4134_v52 }
 0x46e   : > { %v1469_v20 = vsel %vm1056_vm1, %v1444_v13, %v1440_v10 }
 0x46f   : > { %v1421_v12 = vpop.permute.xlu0 %1420  ;;  %v1430_v18 = vpop.permute.xlu1 %1429 }
 0x470   : > { %v1448_v14 = vrot.slane %v1421_v12, %v4134_v52  ;;  %v1460_v24 = vrot.slane %v1430_v18, %v4134_v52 }
 0x472   : > { %v1470_v23 = vsel %vm1058_vm2, %v1448_v14, %v1469_v20 }
 0x473   : > { %v1424_v55 = vpop.permute.xlu0 %1423  ;;  %v1436_v41 = vpop.permute.xlu1 %1435 }
 0x474   : > { %v1452_v19 = vrot.slane %v1424_v55, %v4134_v52  ;;  %v1468_v53 = vrot.slane %v1436_v41, %v4134_v52 }
 0x476   : > { %v1471_v34 = vsel %vm1060_vm3, %v1452_v19, %v1470_v23 }
 0x477   : > { %v1427_v21 = vpop.permute.xlu0 %1426 }
 0x478   : > { %v1456_v33 = vrot.slane %v1427_v21, %v4134_v52 }
 0x47a   : > { %v1472_v25 = vsel %vm1062_vm4, %v1456_v33, %v1471_v34 }
 0x47b   : > { %v1433_v26 = vpop.permute.xlu0 %1432  ;;  %v1473_v32 = vsel %vm1064_vm5, %v1460_v24, %v1472_v25 }
 0x47c   : > { %v1464_v50 = vrot.slane %v1433_v26, %v4134_v52 }
 0x47e   : > { %v1474_v60 = vsel %vm1066_vm6, %v1464_v50, %v1473_v32 }
 0x47f   : > { %v1475_v46 = vsel %vm1068_vm7, %v1468_v53, %v1474_v60 }
 0x480   : > { %v1477_v6 = vsel %vm1071_vm8, %v1475_v46, -inf }
 0x481   : > { %1478 = vmax.xlane.f32.xlu0 %v1477_v6 }
 0x50a   : > { %v1479_v9 = vpop.xlane.xlu0 %1478 }
 0x50b   : > { %v1484_v11 = vrot.slane %v1479_v9, %v4119_v51  ;;  %v1488_v12 = vrot.slane %v1479_v9, %v4157_v15  ;;  %v1492_v13 = vrot.slane %v1479_v9, %v4160_v16  ;;  %v1496_v18 = vrot.slane %v1479_v9, %v4163_v17 }
 0x50c   : > { %v1500_v21 = vrot.slane %v1479_v9, %v4169_v22  ;;  %v1504_v34 = vrot.slane %v1479_v9, %v4181_v30  ;;  %v1508_v24 = vrot.slane %v1479_v9, %v4188_v38 }
 0x50d   : > { %v1521_v10 = vsub.f32 %v1397_v49, %v1484_v11  ;;  %v1522_v55 = vsub.f32 %v1398_v45, %v1488_v12  ;;  %v1523_v19 = vsub.f32 %v1399_v56, %v1492_v13  ;;  %v1524_v23 = vsub.f32 %v1400_v63, %v1496_v18 }
 0x50e   : > { %v1525_v41 = vsub.f32 %v1401_v42, %v1500_v21  ;;  %v1526_v49 = vsub.f32 %v1402_v59, %v1504_v34  ;;  %v1512_v56 = vrot.slane %v1479_v9, %v4195_v47  ;;  %v1527_v50 = vsub.f32 %v1403_v7, %v1508_v24 }
 0x50f   : > { %v1529_v14 = vmul.f32 1.442695, %v1521_v10  ;;  %v1531_v20 = vmul.f32 1.442695, %v1522_v55  ;;  %v1533_v33 = vmul.f32 1.442695, %v1523_v19 }
 0x510   : > { %v1535_v25 = vmul.f32 1.442695, %v1524_v23  ;;  %v1537_v45 = vmul.f32 1.442695, %v1525_v41  ;;  %v1539_v63 = vmul.f32 1.442695, %v1526_v49  ;;  %v1528_v42 = vsub.f32 %v4299_v4, %v1512_v56 }
 0x511   : > { %3499 = vpow2.f32 %v1529_v14  ;;  %v1541_v32 = vmul.f32 1.442695, %v1527_v50 }
 0x512   : > { %3501 = vpow2.f32 %v1531_v20  ;;  %v1543_v60 = vmul.f32 1.442695, %v1528_v42 }
 0x513   : > { %3503 = vpow2.f32 %v1533_v33 }
 0x514   : > { %3505 = vpow2.f32 %v1535_v25 }
 0x515   : > { %3507 = vpow2.f32 %v1537_v45 }
 0x516   : > { %3509 = vpow2.f32 %v1539_v63 }
 0x517   : > { %3511 = vrcp.f32 %v4257_v8 }
 0x518   : > { %3513 = vpow2.f32 %v1541_v32 }
 0x519   : > { %3515 = vpow2.f32 %v1543_v60 }
 0x51e   : > { %v4326_v26 = vpop.eup %3499 }
 0x51f   : > { %1554 = vperm.xlu1 %3459, %v4326_v26   ;;  %v4330_v53 = vpop.eup %3501 }
 0x520   : > { %v4334_v59 = vpop.eup %3503 }
 0x521   : > { %v4338_v46 = vpop.eup %3505 }
 0x522   : > { %v4341_v7 = vpop.eup %3507 }
 0x523   : > { %1557 = vperm.xlu1 %3459, %v4330_v53   ;;  %v4344_v4 = vpop.eup %3509 }
 0x524   : > { %v4347_v6 = vpop.eup %3511 }
 0x525   : > { %v4349_v9 = vpop.eup %3513  ;;  %v1271_v8 = vrot.slane %v4347_v6, %v4119_v51  ;;  %v1275_v13 = vrot.slane %v4347_v6, %v4157_v15  ;;  %v1279_v55 = vrot.slane %v4347_v6, %v4160_v16  ;;  %v1283_v18 = vrot.slane %v4347_v6, %v4163_v17 }
 0x526   : > { %v4354_v11 = vpop.eup %3515 }
 0x527   : > { %1560 = vperm.xlu1 %3459, %v4334_v59   ;;  %v1308_v12 = vmul.f32 %v4205_v57, %v1271_v8  ;;  %v1309_v10 = vmul.f32 %v4207_v58, %v1275_v13  ;;  %v1310_v14 = vmul.f32 %v4214_v44, %v1279_v55  ;;  %v1311_v19 = vmul.f32 %v4218_v61, %v1283_v18 }
 0x528   : > { %v1287_v57 = vrot.slane %v4347_v6, %v4169_v22 }
 0x52a   : > { %v1312_v20 = vmul.f32 %v4221_v62, %v1287_v57 }
 0x52b   : > { %1563 = vperm.xlu1 %3459, %v4338_v46  }
 0x52f   : > { %1566 = vperm.xlu1 %3459, %v4341_v7  }
 0x533   : > { %1569 = vperm.xlu1 %3459, %v4344_v4  }
 0x537   : > { %1572 = vperm.xlu1 %3459, %v4349_v9  }
 0x53b   : > { %1575 = vperm.xlu1 %3459, %v4354_v11  }
 0x53f   : > { %1679 = vperm.xlu1 %3459, %v1308_v12  }
 0x543   : > { %1682 = vperm.xlu1 %3459, %v1309_v10  }
 0x547   : > { %1685 = vperm.xlu1 %3459, %v1310_v14  }
 0x54b   : > { %1688 = vperm.xlu1 %3459, %v1311_v19  }
 0x54f   : > { %1691 = vperm.xlu1 %3459, %v1312_v20  }
 0x59a   : > { %v1555_v58 = vpop.permute.xlu1 %1554 }
 0x59b   : > { %v1580_v24 = vrot.slane %v1555_v58, %v4134_v52 }
 0x59e   : > { %v1558_v21 = vpop.permute.xlu1 %1557 }
 0x59f   : > { %v1584_v44 = vrot.slane %v1558_v21, %v4134_v52 }
 0x5a1   : > { %v1609_v62 = vsel %vm1056_vm1, %v1584_v44, %v1580_v24 }
 0x5a2   : > { %v1561_v23 = vpop.permute.xlu1 %1560 }
 0x5a3   : > { %v1588_v25 = vrot.slane %v1561_v23, %v4134_v52 }
 0x5a5   : > { %v1610_v50 = vsel %vm1058_vm2, %v1588_v25, %v1609_v62 }
 0x5a6   : > { %v1564_v33 = vpop.permute.xlu1 %1563 }
 0x5a7   : > { %v1592_v61 = vrot.slane %v1564_v33, %v4134_v52 }
 0x5a9   : > { %v1611_v42 = vsel %vm1060_vm3, %v1592_v61, %v1610_v50 }
 0x5aa   : > { %v1567_v34 = vpop.permute.xlu1 %1566 }
 0x5ab   : > { %v1596_v49 = vrot.slane %v1567_v34, %v4134_v52 }
 0x5ad   : > { %v1612_v32 = vsel %vm1062_vm4, %v1596_v49, %v1611_v42 }
 0x5ae   : > { %v1570_v41 = vpop.permute.xlu1 %1569 }
 0x5af   : > { %v1600_v56 = vrot.slane %v1570_v41, %v4134_v52  ;;  %v1291_v41 = vrot.slane %v4347_v6, %v4181_v30 }
 0x5b1   : > { %v1613_v8 = vsel %vm1064_vm5, %v1600_v56, %v1612_v32 }
 0x5b2   : > { %v1573_v45 = vpop.permute.xlu1 %1572 }
 0x5b3   : > { %v1604_v63 = vrot.slane %v1573_v45, %v4134_v52 }
 0x5b5   : > { %v1614_v13 = vsel %vm1066_vm6, %v1604_v63, %v1613_v8 }
 0x5b6   : > { %v1576_v60 = vpop.permute.xlu1 %1575 }
 0x5b7   : > { %v1608_v12 = vrot.slane %v1576_v60, %v4134_v52 }
 0x5b9   : > { %v1615_v10 = vsel %vm1068_vm7, %v1608_v12, %v1614_v13 }
 0x5ba   : > { %v1617_v55 = vsel %vm1071_vm8, %v1615_v10, 0.0 }
 0x5bb   : > { %1618 = vadd.xlane.f32.xlu0 %v1617_v55 }
 0x644   : > { %v1619_v14 = vpop.xlane.xlu0 %1618 }
 0x645   : > { %3517 = vrcp.f32 %v1619_v14 }
 0x652   : > { %v3518_v18 = vpop.eup %3517 }
 0x653   : > { %v1629_v19 = vrot.slane %v3518_v18, %v4157_v15  ;;  %v1625_v57 = vrot.slane %v3518_v18, %v4119_v51  ;;  %v1633_v21 = vrot.slane %v3518_v18, %v4160_v16  ;;  %v1637_v23 = vrot.slane %v3518_v18, %v4163_v17 }
 0x654   : > { %v1641_v15 = vrot.slane %v3518_v18, %v4169_v22  ;;  %v1313_v51 = vmul.f32 %v4224_v1, %v1291_v41  ;;  %v1295_v16 = vrot.slane %v4347_v6, %v4188_v38  ;;  %v1645_v17 = vrot.slane %v3518_v18, %v4181_v30  ;;  %v685_v41 = vld [vmem:[#allocation8 + $0x78] sm:$0xff] }
 0x655   : > { %v1663_v20 = vmul.f32 %v4330_v53, %v1629_v19  ;;  %v1662_v58 = vmul.f32 %v4326_v26, %v1625_v57  ;;  %v1664_v33 = vmul.f32 %v4334_v59, %v1633_v21  ;;  %v1665_v34 = vmul.f32 %v4338_v46, %v1637_v23 }
 0x656   : > { %v1666_v26 = vmul.f32 %v4341_v7, %v1641_v15  ;;  %v1314_v53 = vmul.f32 %v4227_v3, %v1295_v16  ;;  %v1667_v59 = vmul.f32 %v4344_v4, %v1645_v17  ;;  %v1299_v22 = vrot.slane %v4347_v6, %v4195_v47 }
 0x657   : > { %1754 = vperm.xlu1 %3459, %v1663_v20   ;;  %1751 = vperm.xlu0 %3460, %v1662_v58   ;;  %v1649_v46 = vrot.slane %v3518_v18, %v4188_v38  ;;  %v1653_v44 = vrot.slane %v3518_v18, %v4195_v47  ;;  %v1680_v38 = vpop.permute.xlu1 %1679 }
 0x658   : > { %v1315_v1 = vmul.f32 %v4230_v5, %v1299_v22 }
 0x659   : > { %v1668_v7 = vmul.f32 %v4349_v9, %v1649_v46  ;;  %v1669_v30 = vmul.f32 %v4354_v11, %v1653_v44  ;;  %v683_v44 = vld [vmem:[#allocation8 + $0x68] sm:$0xff] }
 0x65b   : > { %1757 = vperm.xlu1 %3459, %v1664_v33   ;;  %1760 = vperm.xlu0 %3460, %v1665_v34   ;;  %v1683_v47 = vpop.permute.xlu1 %1682  ;;  %v701_v34 = vld [vmem:[#allocation10 + $0x78] sm:$0xff] }
 0x65f   : > { %1694 = vperm.xlu1 %3459, %v1313_v51   ;;  %1763 = vperm.xlu0 %3460, %v1666_v26   ;;  %v1686_v3 = vpop.permute.xlu1 %1685 }
 0x660   : > { %v1713_v61 = vrot.slane %v1686_v3, %v4134_v52 }
 0x663   : > { %1697 = vperm.xlu1 %3459, %v1314_v53   ;;  %1766 = vperm.xlu0 %3460, %v1667_v59   ;;  %v1689_v5 = vpop.permute.xlu1 %1688  ;;  %v3523_v53 = vld [vmem:[%s4040_s18 + $0x38] sm:$0xff]  ;;  %v684_v59 = vld [vmem:[#allocation8 + $0x70] sm:$0xff]  ;;  %s4582_s18 = scalar_lea.hbm %s4733_s0, %s3069_s26 }
 0x667   : > { %1700 = vperm.xlu1 %3459, %v1315_v1   ;;  %1769 = vperm.xlu0 %3460, %v1668_v7   ;;  %v700_v7 = vld [vmem:[#allocation10 + $0x70] sm:$0xff] }
 0x66b   : > { %2623 = vperm.xlu1 %3459, %v4269_v28   ;;  %1772 = vperm.xlu0 %3460, %v1669_v30   ;;  %v1692_v28 = vpop.permute.xlu1 %1691 }
 0x66c   : > { %v1721_v49 = vrot.slane %v1692_v28, %v4134_v52 }
 0x66f   : > { %2629 = vperm.xlu1 %3459, %v4272_v29   ;;  %2626 = vperm.xlu0 %3460, %v4266_v27   ;;  %v1705_v27 = vrot.slane %v1680_v38, %v4134_v52 }
 0x673   : > { %2635 = vperm.xlu1 %3459, %v4291_v54   ;;  %2632 = vperm.xlu0 %3460, %v4281_v43  }
 0x677   : > { %2641 = vperm.xlu1 %3459, %v4297_v2   ;;  %2638 = vperm.xlu0 %3460, %v4275_v31  }
 0x67b   : > { %2644 = vperm.xlu0 %3460, %v4287_v48   ;;  %v1709_v48 = vrot.slane %v1683_v47, %v4134_v52 }
 0x67d   : > { %v2605_v63 = vsel %vm1056_vm1, %v1709_v48, %v1705_v27 }
 0x67e   : > { %v2606_v32 = vsel %vm1058_vm2, %v1713_v61, %v2605_v63  ;;  %v681_v63 = vld [vmem:[#allocation8 + $0x58] sm:$0xff] }
 0x6d2   : > { %v1752_v4 = vpop.permute.xlu0 %1751  ;;  %v1755_v29 = vpop.permute.xlu1 %1754 }
 0x6d3   : > { %v1777_v54 = vrot.slane %v1752_v4, %v4134_v52  ;;  %v1781_v2 = vrot.slane %v1755_v29, %v4134_v52  ;;  %v698_v29 = vld [vmem:[#allocation10 + $0x60] sm:$0xff] }
 0x6d5   : > { %v1815_v43 = vsel %vm1814_vm9, %v1705_v27, %v1777_v54  ;;  %v1816_v9 = vsel %vm1814_vm9, %v1709_v48, %v1781_v2  ;;  %v2687_v13 = vsel %vm1056_vm1, %v1781_v2, %v1777_v54 }
 0x6d6   : > { %v1761_v6 = vpop.permute.xlu0 %1760  ;;  %3249 = vmatmul.mubr.msk.f32.vlgmr.msra.gmra.mxu0 %vm1071_vm8, %v1815_v43  ;;  %v1758_v31 = vpop.permute.xlu1 %1757 }
 0x6d7   : > { %3252 = vmatpush3.msra.mxu0 %v4085_v35  ;;  %3253 = vmatprep.mubr.msk.f32.mxu0 %vm3795_vm0, %v3794_v0  ;;  %v1785_v11 = vrot.slane %v1758_v31, %v4134_v52  ;;  %v1717_v35 = vrot.slane %v1689_v5, %v4134_v52  ;;  %v1789_v62 = vrot.slane %v1761_v6, %v4134_v52  ;;  %v699_v5 = vld [vmem:[#allocation10 + $0x68] sm:$0xff] }
 0x6d8   : > { %3256 = vmatprep.subr.mxu0 %v3794_v0 }
 0x6d9   : > { %v1817_v56 = vsel %vm1814_vm9, %v1713_v61, %v1785_v11  ;;  %v2607_v8 = vsel %vm1060_vm3, %v1717_v35, %v2606_v32  ;;  %v1818_v10 = vsel %vm1814_vm9, %v1717_v35, %v1789_v62  ;;  %v2688_v14 = vsel %vm1058_vm2, %v1785_v11, %v2687_v13  ;;  %v679_v32 = vld [vmem:[#allocation8 + $0x48] sm:$0xff]  ;;  %v677_v13 = vld [vmem:[#allocation8 + $0x38] sm:$0xff] }
 0x6da   : > { %v1764_v25 = vpop.permute.xlu0 %1763  ;;  %3254 = vmatmul.mubr.msk.f32.vlgmr.msra.gmra.mxu0 %vm1071_vm8, %v1816_v9  ;;  %v1695_v24 = vpop.permute.xlu1 %1694  ;;  %v2689_v21 = vsel %vm1060_vm3, %v1789_v62, %v2688_v14  ;;  %v675_v14 = vld [vmem:[#allocation8 + $0x28] sm:$0xff] }
 0x6db   : > { %v1793_v45 = vrot.slane %v1764_v25, %v4134_v52  ;;  %3257 = vmatpush3.msra.mxu0 %v4088_v36  ;;  %3258 = vmatprep.mubr.msk.f32.mxu0 %vm3795_vm0, %v3794_v0  ;;  %v1725_v60 = vrot.slane %v1695_v24, %v4134_v52 }
 0x6dc   : > { %3261 = vmatprep.subr.mxu0 %v3794_v0 }
 0x6dd   : > { %v1819_v50 = vsel %vm1814_vm9, %v1721_v49, %v1793_v45  ;;  %v2690_v15 = vsel %vm1062_vm4, %v1793_v45, %v2689_v21  ;;  %v687_v21 = vld [vmem:[#allocation10 + $0x8] sm:$0xff] }
 0x6de   : > { %v1767_v42 = vpop.permute.xlu0 %1766  ;;  %3259 = vmatmul.mubr.msk.f32.vlgmr.msra.gmra.mxu0 %vm1071_vm8, %v1817_v56  ;;  %3269 = vmatmul.mubr.msk.f32.vlgmr.msra.gmra.mxu1 %vm1071_vm8, %v1819_v50  ;;  %v1698_v36 = vpop.permute.xlu1 %1697  ;;  %v682_v56 = vld [vmem:[#allocation8 + $0x60] sm:$0xff]  ;;  %v697_v50 = vld [vmem:[#allocation10 + $0x58] sm:$0xff] }
 0x6df   : > { %3262 = vmatpush3.msra.mxu0 %v4094_v37  ;;  %3263 = vmatprep.mubr.msk.f32.mxu0 %vm3795_vm0, %v3794_v0  ;;  %v1729_v12 = vrot.slane %v1698_v36, %v4134_v52  ;;  %v1797_v55 = vrot.slane %v1767_v42, %v4134_v52  ;;  %v2608_v37 = vsel %vm1062_vm4, %v1721_v49, %v2607_v8  ;;  %v696_v42 = vld [vmem:[#allocation10 + $0x50] sm:$0xff]  ;;  %v695_v36 = vld [vmem:[#allocation10 + $0x48] sm:$0xff]  ;;  %v678_v8 = vld [vmem:[#allocation8 + $0x40] sm:$0xff] }
 0x6e0   : > { %3271 = vmatprep.subr.mxu0 %v3794_v0  ;;  %3277 = vmatpush3.msra.mxu1 %v4107_v40  ;;  %v2609_v40 = vsel %vm1064_vm5, %v1725_v60, %v2608_v37  ;;  %v691_v37 = vld [vmem:[#allocation10 + $0x28] sm:$0xff] }
 0x6e1   : > { %3278 = vmatprep.mubr.msk.f32.mxu1 %vm3795_vm0, %v3794_v0  ;;  %3286 = vmatprep.subr.mxu1 %v3794_v0  ;;  %v2610_v58 = vsel %vm1066_vm6, %v1729_v12, %v2609_v40  ;;  %v1820_v23 = vsel %vm1814_vm9, %v1725_v60, %v1797_v55  ;;  %v2691_v16 = vsel %vm1064_vm5, %v1797_v55, %v2690_v15  ;;  %v694_v60 = vld [vmem:[#allocation10 + $0x40] sm:$0xff]  ;;  %v676_v55 = vld [vmem:[#allocation8 + $0x30] sm:$0xff]  ;;  %v689_v40 = vld [vmem:[#allocation10 + $0x18] sm:$0xff] }
 0x6e2   : > { %v1770_v18 = vpop.permute.xlu0 %1769  ;;  %3264 = vmatmul.mubr.msk.f32.vlgmr.msra.gmra.mxu0 %vm1071_vm8, %v1818_v10  ;;  %v1701_v19 = vpop.permute.xlu1 %1700  ;;  %v692_v10 = vld [vmem:[#allocation10 + $0x30] sm:$0xff] }
 0x6e3   : > { %v1801_v57 = vrot.slane %v1770_v18, %v4134_v52  ;;  %3272 = vmatpush3.msra.mxu0 %v4104_v39  ;;  %v1733_v20 = vrot.slane %v1701_v19, %v4134_v52  ;;  %3273 = vmatprep.mubr.msk.f32.mxu0 %vm3795_vm0, %v3794_v0  ;;  %v690_v18 = vld [vmem:[#allocation10 + $0x20] sm:$0xff] }
 0x6e4   : > { %3281 = vmatprep.subr.mxu0 %v3794_v0  ;;  %v674_v19 = vld [vmem:[#allocation8 + $0x20] sm:$0xff] }
 0x6e5   : > { %v1821_v39 = vsel %vm1814_vm9, %v1729_v12, %v1801_v57  ;;  %v2611_v33 = vsel %vm1068_vm7, %v1733_v20, %v2610_v58  ;;  %v2692_v22 = vsel %vm1066_vm6, %v1801_v57, %v2691_v16  ;;  %v693_v12 = vld [vmem:[#allocation10 + $0x38] sm:$0xff]  ;;  %v672_v58 = vld [vmem:[#allocation8 + $0x10] sm:$0xff] }
 0x6e6   : > { %2613 = vst.msk [vmem:[%s618_s28] sm:$0xff] %vm1071_vm8, %v2611_v33  ;;  %v1773_v51 = vpop.permute.xlu0 %1772  ;;  %3274 = vmatmul.mubr.msk.f32.vlgmr.msra.gmra.mxu0 %vm1071_vm8, %v1820_v23  ;;  %3279 = vmatmul.mubr.msk.f32.vlgmr.msra.gmra.mxu1 %vm1071_vm8, %v1821_v39  ;;  %v2624_v26 = vpop.permute.xlu1 %2623  ;;  %v673_v57 = vld [vmem:[#allocation8 + $0x18] sm:$0xff]  ;;  %v671_v23 = vld [vmem:[#allocation8 + $0x8] sm:$0xff]  ;;  %v686_v39 = vld [vmem:[#allocation10] sm:$0xff]  ;;  %s2732_s28 = sshll.u32 %s573_s23, 4  ;;  %s4570_s28 = int_to_ptr.vmem [resolvable:$true] %s2732_s28 }
 0x6e7   : > { %v1805_v17 = vrot.slane %v1773_v51, %v4134_v52  ;;  %3282 = vmatpush3.msra.mxu0 %v3523_v53  ;;  %3283 = vmatprep.mubr.msk.f32.mxu0 %vm3795_vm0, %v3794_v0  ;;  %v2649_v47 = vrot.slane %v2624_v26, %v4134_v52  ;;  %v670_v33 = vld [vmem:[#allocation8] sm:$0xff]  ;;  %s3657_s1 = scalar_lea.vmem %s4570_s28, 128  ;;  %p3664_p0 = scmp.lt.s32.totalorder %s4570_s28, %s3662_s5 }
 0x6e8   : > { %3321 = vmatprep.subr.mxu0 %v701_v34  ;;  %3287 = vmatpush3.msra.mxu1 %v685_v41  ;;  %p3658_p12 = scmp.ne.s32.totalorder %s4570_s28, %s3657_s1 }
 0x6e9   : > { %v1822_v46 = vsel %vm1814_vm9, %v1733_v20, %v1805_v17  ;;  %v2693_v1 = vsel %vm1068_vm7, %v1805_v17, %v2692_v22  ;;  %3288 = vmatprep.subr.mxu1 %v3794_v0  ;;  %3318 = vmatprep.mubr.msk.f32.mxu1 %vm3795_vm0, %v3794_v0  ;;  %v688_v20 = vld [vmem:[#allocation10 + $0x10] sm:$0xff] }
 0x6ea   : > { %2695 = vst.msk [vmem:[%s626_s21] sm:$0xff] %vm1071_vm8, %v2693_v1  ;;  %v2627_v30 = vpop.permute.xlu0 %2626  ;;  %3284 = vmatmul.mubr.msk.f32.vlgmr.msra.gmra.mxu0 %vm1071_vm8, %v1822_v46  ;;  %v2630_v38 = vpop.permute.xlu1 %2629  ;;  %3289 = vmatpush3.msra.mxu1 %v684_v59  ;;  %s2745_s21 = sshll.u32 %s4698_s19, 4  ;;  %p3659_p1 = pnand %p3658_p12, %p4734_p7  ;;  %s4577_s21 = int_to_ptr.vmem [resolvable:$true] %s2745_s21 }
 0x6eb   : > { %v2653_v3 = vrot.slane %v2627_v30, %v4134_v52  ;;  %3322 = vmatpush3.msra.mxu0 %v701_v34  ;;  %3290 = vmatprep.subr.mxu1 %v3794_v0  ;;  %v2657_v28 = vrot.slane %v2630_v38, %v4134_v52  ;;  %v3524_v34 = vld [vmem:[%s4078_s25] sm:$0xff]  ;;  %s587_s25 = scalar_lea.vmem [#allocation14], %s4544_s4 }
 0x6ec   : > { %3323 = vmatprep.subr.mxu0 %v700_v7  ;;  %3291 = vmatpush3.msra.mxu1 %v683_v44  ;;  %s2758_s6 = sshll.u32 %s587_s25, 4  ;;  %p3660_p13 = pneg %p3659_p1  ;;  %s4559_s6 = int_to_ptr.vmem [resolvable:$true] %s2758_s6 }
 0x6ed   : > { %v2678_v4 = vsel %vm1056_vm1, %v2653_v3, %v2649_v47  ;;  %3324 = vmatpush3.msra.mxu0 %v700_v7  ;;  %3292 = vmatprep.subr.mxu1 %v3794_v0 }
 0x6ee   : > { %v2633_v27 = vpop.permute.xlu0 %2632  ;;  %v2636_v54 = vpop.permute.xlu1 %2635  ;;  %3325 = vmatprep.subr.mxu0 %v699_v5  ;;  %v2679_v2 = vsel %vm1058_vm2, %v2657_v28, %v2678_v4  ;;  %3293 = vmatpush3.msra.mxu1 %v682_v56 }
 0x6ef   : > { %v2661_v43 = vrot.slane %v2633_v27, %v4134_v52  ;;  %3326 = vmatpush3.msra.mxu0 %v699_v5  ;;  %v2665_v6 = vrot.slane %v2636_v54, %v4134_v52  ;;  %3294 = vmatprep.subr.mxu1 %v3794_v0 }
 0x6f0   : > { %3327 = vmatprep.subr.mxu0 %v698_v29  ;;  %3295 = vmatpush3.msra.mxu1 %v681_v63 }
 0x6f1   : > { %v2680_v31 = vsel %vm1060_vm3, %v2661_v43, %v2679_v2  ;;  %3328 = vmatpush3.msra.mxu0 %v698_v29  ;;  %3296 = vmatprep.subr.mxu1 %v3794_v0 }
 0x6f2   : > { %v2639_v48 = vpop.permute.xlu0 %2638  ;;  %v2642_v9 = vpop.permute.xlu1 %2641  ;;  %v2681_v25 = vsel %vm1062_vm4, %v2665_v6, %v2680_v31  ;;  %3329 = vmatprep.subr.mxu0 %v697_v50 }
 0x6f3   : > { %v2669_v11 = vrot.slane %v2639_v48, %v4134_v52  ;;  %v2673_v24 = vrot.slane %v2642_v9, %v4134_v52  ;;  %3330 = vmatpush3.msra.mxu0 %v697_v50 }
 0x6f4   : > { %3331 = vmatprep.subr.mxu0 %v696_v42 }
 0x6f5   : > { %v2682_v61 = vsel %vm1064_vm5, %v2669_v11, %v2681_v25  ;;  %3332 = vmatpush3.msra.mxu0 %v696_v42 }
 0x6f6   : > { %v2645_v49 = vpop.permute.xlu0 %2644  ;;  %v2683_v35 = vsel %vm1066_vm6, %v2673_v24, %v2682_v61  ;;  %3333 = vmatprep.subr.mxu0 %v695_v36 }
 0x6f7   : > { %v2677_v45 = vrot.slane %v2645_v49, %v4134_v52  ;;  %v680_v52 = vld [vmem:[#allocation8 + $0x50] sm:$0xff]  ;;  %3334 = vmatpush3.msra.mxu0 %v695_v36 }
 0x6f8   : > { %3297 = vmatpush3.msra.mxu1 %v680_v52  ;;  %3335 = vmatprep.subr.mxu0 %v694_v60 }
 0x6f9   : > { %v2684_v62 = vsel %vm1068_vm7, %v2677_v45, %v2683_v35  ;;  %3298 = vmatprep.subr.mxu1 %v3794_v0  ;;  %3336 = vmatpush3.msra.mxu0 %v694_v60 }
 0x6fa   : > { %2686 = vst.msk [vmem:[%s622_s11] sm:$0xff] %vm1071_vm8, %v2684_v62  ;;  %3299 = vmatpush3.msra.mxu1 %v679_v32  ;;  %3337 = vmatprep.subr.mxu0 %v693_v12  ;;  %s4568_s11 = scalar_lea.hbm %s4682_s9, %s3069_s26 }
 0x6fb   : > { %3300 = vmatprep.subr.mxu1 %v3794_v0  ;;  %3338 = vmatpush3.msra.mxu0 %v693_v12 }
 0x6fc   : > { %3301 = vmatpush3.msra.mxu1 %v678_v8  ;;  %3339 = vmatprep.subr.mxu0 %v692_v10  ;;  %v3065_v8 = vld [vmem:[%s4681_s8] ss:$0 sm:$0xff] }
 0x6fd   : > { %3302 = vmatprep.subr.mxu1 %v3794_v0  ;;  %3340 = vmatpush3.msra.mxu0 %v692_v10 }
 0x6fe   : > { %3303 = vmatpush3.msra.mxu1 %v677_v13  ;;  %3341 = vmatprep.subr.mxu0 %v691_v37 }
 0x6ff   : > { %3304 = vmatprep.subr.mxu1 %v3794_v0  ;;  %3342 = vmatpush3.msra.mxu0 %v691_v37 }
 0x700   : > { %3305 = vmatpush3.msra.mxu1 %v676_v55  ;;  %3343 = vmatprep.subr.mxu0 %v690_v18 }
 0x701   : > { %3306 = vmatprep.subr.mxu1 %v3794_v0  ;;  %3344 = vmatpush3.msra.mxu0 %v690_v18 }
 0x702   : > { %3307 = vmatpush3.msra.mxu1 %v675_v14  ;;  %3345 = vmatprep.subr.mxu0 %v689_v40 }
 0x703   : > { %3308 = vmatprep.subr.mxu1 %v3794_v0  ;;  %3346 = vmatpush3.msra.mxu0 %v689_v40 }
 0x704   : > { %3309 = vmatpush3.msra.mxu1 %v674_v19  ;;  %3347 = vmatprep.subr.mxu0 %v688_v20 }
 0x705   : > { %3310 = vmatprep.subr.mxu1 %v3794_v0  ;;  %3348 = vmatpush3.msra.mxu0 %v688_v20 }
 0x706   : > { %3311 = vmatpush3.msra.mxu1 %v673_v57  ;;  %3349 = vmatprep.subr.mxu0 %v687_v21 }
 0x707   : > { %3312 = vmatprep.subr.mxu1 %v3794_v0  ;;  %3350 = vmatpush3.msra.mxu0 %v687_v21 }
 0x708   : > { %3313 = vmatpush3.msra.mxu1 %v672_v58  ;;  %3351 = vmatprep.subr.mxu0 %v686_v39 }
 0x709   : > { %3314 = vmatprep.subr.mxu1 %v3794_v0  ;;  %3352 = vmatpush3.msra.mxu0 %v686_v39 }
 0x70a   : > { %3315 = vmatpush3.msra.mxu1 %v671_v23 }
 0x70b   : > { %3316 = vmatprep.subr.mxu1 %v3794_v0 }
 0x70c   : > { %3317 = vmatpush3.msra.mxu1 %v670_v33 }
 0x70d   : > { %3319 = vmatmul.mubr.f32.vlgmr.msra.gmra.mxu1 %v3524_v34 }
 0x796   : > { %v1892_v41 = vpop.f32.mrf.mxu0 }
 0x797   : > { %v2500_v7 = vrot.slane %v1892_v41, 1 }
 0x798   : > { %v3250_v15 = vpop.f32.mrf.mxu0 }
 0x79a   : > { %v1965_v51 = vpop.f32.mrf.mxu0 }
 0x79b   : > { %v2485_v53 = vrot.slane %v1965_v51, 7  ;;  %v2501_v0 = vsel %vm1056_vm1, %v1965_v51, %v2500_v7 }
 0x79c   : > { %v3255_v26 = vpop.f32.mrf.mxu0 }
 0x79d   : > { %v2486_v30 = vsel %vm1056_vm1, %v2485_v53, %v1892_v41 }
 0x79e   : > { %v2038_v16 = vpop.f32.mrf.mxu0  ;;  %v2184_v17 = vpop.f32.mrf.mxu1 }
 0x79f   : > { %v2487_v59 = vrot.slane %v2038_v16, 6  ;;  %v2502_v22 = vrot.slane %v2038_v16, 7  ;;  %v2491_v27 = vrot.slane %v2184_v17, 4  ;;  %v2506_v54 = vrot.slane %v2184_v17, 5 }
 0x7a0   : > { %v3260_v46 = vpop.f32.mrf.mxu0  ;;  %v3270_v1 = vpop.f32.mrf.mxu1 }
 0x7a1   : > { %v2488_v3 = vsel %vm1058_vm2, %v2487_v59, %v2486_v30  ;;  %v2503_v5 = vsel %vm1058_vm2, %v2502_v22, %v2501_v0 }
 0x7a2   : > { %v2111_v44 = vpop.f32.mrf.mxu0 }
 0x7a3   : > { %v2489_v38 = vrot.slane %v2111_v44, 5  ;;  %v2504_v47 = vrot.slane %v2111_v44, 6 }
 0x7a4   : > { %v3265_v28 = vpop.f32.mrf.mxu0 }
 0x7a5   : > { %v2490_v4 = vsel %vm1060_vm3, %v2489_v38, %v2488_v3  ;;  %v2505_v29 = vsel %vm1060_vm3, %v2504_v47, %v2503_v5 }
 0x7a6   : > { %v2257_v43 = vpop.f32.mrf.mxu0  ;;  %v2330_v2 = vpop.f32.mrf.mxu1  ;;  %v2507_v48 = vsel %vm1062_vm4, %v2506_v54, %v2505_v29  ;;  %v2492_v61 = vsel %vm1062_vm4, %v2491_v27, %v2490_v4 }
 0x7a7   : > { %v2493_v6 = vrot.slane %v2257_v43, 3  ;;  %v2508_v31 = vrot.slane %v2257_v43, 4  ;;  %v2495_v9 = vrot.slane %v2330_v2, 2  ;;  %v2510_v11 = vrot.slane %v2330_v2, 3 }
 0x7a8   : > { %v3275_v25 = vpop.f32.mrf.mxu0  ;;  %v3280_v24 = vpop.f32.mrf.mxu1 }
 0x7a9   : > { %v2509_v49 = vsel %vm1064_vm5, %v2508_v31, %v2507_v48  ;;  %v2494_v45 = vsel %vm1064_vm5, %v2493_v6, %v2492_v61 }
 0x7aa   : > { %v2403_v35 = vpop.f32.mrf.mxu0  ;;  %v2496_v63 = vsel %vm1066_vm6, %v2495_v9, %v2494_v45  ;;  %v2511_v42 = vsel %vm1066_vm6, %v2510_v11, %v2509_v49 }
 0x7ab   : > { %v2497_v62 = vrot.slane %v2403_v35, 1  ;;  %v2512_v56 = vrot.slane %v2403_v35, 2 }
 0x7ac   : > { %v3285_v50 = vpop.f32.mrf.mxu0 }
 0x7ad   : > { %v2498_v52 = vsel %vm1068_vm7, %v2497_v62, %v2496_v63  ;;  %v2513_v36 = vsel %vm1068_vm7, %v2512_v56, %v2511_v42 }
 0x7ae   : > { %3353 = vmatprep.mubr.f32.mxu0 %v2498_v52  ;;  %2604 = vst [vmem:[%s587_s25] sm:$0xff] %v2498_v52  ;;  %s3663_s25 = scalar_lea.vmem %s3662_s5, 256 }
 0x7af   : > { %3354 = vmatmul.mubr.f32.vlgmr.msra.gmra.mxu0 %v2513_v36  ;;  %p3665_p11 = scmp.lt.s32.totalorder %s3663_s25, %s3657_s1 }
 0x7b1   : > { %p3666_p5 = por %p3665_p11, %p3664_p0 }
 0x7b3   : > { %p3667_p6 = pnand %p3666_p5, %p3660_p13 }
 0x7cd   : > { %v2473_v32 = vpop.f32.mrf.mxu1 }
 0x7cf   : > { %v3320_v60 = vpop.f32.mrf.mxu1 }
 0x86f   : > { %v3355_v12 = vpop.f32.mrf.mxu0 }
 0x870   : > { %v2599_v13 = vadd.f32 %v3355_v12, %v2473_v32 }
 0x871   : > { %v2581_v10 = vpop.f32.mrf.mxu0 }
 0x872   : > { %v2600_v55 = vadd.f32 %v3065_v8, %v2599_v13  ;;  %v2590_v37 = vadd.f32 %v2581_v10, %v2473_v32 }
 0x874   : > { %3519 = vtanh.f32 %v2600_v55  ;;  %v2597_v14 = vadd.f32 %v3065_v8, %v2590_v37 }
 0x876   : > { %3521 = vtanh.f32 %v2597_v14 }
 0x881   : > { %v3520_v18 = vpop.eup %3519 }
 0x882   : > { %2602 = vst [vmem:[%s573_s23] sm:$0xff] %v3520_v18 }
 0x883   : > { %v3522_v19 = vpop.eup %3521 }
 0x884   : > { %3670 = shalt.err (!%p3667_p6)
}
 0x885   : > { %s3671_s26 = scalar_lea.hbm %s4568_s11, 128  ;;  %s3675_s2 = scalar_lea.hbm %s4682_s9, 256 }
 0x886   : > { %p3672_p4 = scmp.ne.s32.totalorder %s4568_s11, %s3671_s26  ;;  %p3676_p2 = scmp.lt.s32.totalorder %s4568_s11, %s4682_s9 }
 0x887   : > { %p3677_p3 = scmp.lt.s32.totalorder %s3675_s2, %s3671_s26 }
 0x888   : > { %p3673_p8 = pnand %p3672_p4, %p4734_p7 }
 0x889   : > { %p3678_p10 = por %p3677_p3, %p3676_p2 }
 0x88a   : > { %p3674_p9 = pneg %p3673_p8 }
 0x88c   : > { %p3679_p12 = pnand %p3678_p10, %p3674_p9 }
 0x88e   : > { %3682 = shalt.err (!%p3679_p12)
}
 0x88f   : > { %3374 = dma.vmem_to_hbm [thread:$0]  (%p4734_p7), %s4570_s28, 128, %s4568_s11, %s2697_s24  }
 0x890   : > { %s4735_s1 = scalar_lea.vmem [#allocation12], %s4544_s4  ;;  %s4736_s5 = sand.u32 1, %s3897_s17  }
 0x891   : > { %2603 = vst [vmem:[%s4735_s1] sm:$0xff] %v3522_v19  ;;  %s4609_s27 = scalar_lea.sflag [#allocation13], %s4736_s5  ;;  %s3683_s25 = scalar_lea.vmem %s4577_s21, 128 }
 0x892   : > { %p3684_p1 = scmp.ne.s32.totalorder %s4577_s21, %s3683_s25  ;;  %s3799_s26 = smov [#allocation12]  }
 0x893   : > { %s3687_s7 = sshll.u32 %s3799_s26, 4  ;;  %s3688_s7 = int_to_ptr.vmem [resolvable:$false] %s3687_s7 }
 0x894   : > { %p3685_p13 = pnand %p3684_p1, %p4734_p7  ;;  %s3689_s23 = scalar_lea.vmem %s3688_s7, 256 }
 0x895   : > { %p3690_p11 = scmp.lt.s32.totalorder %s4577_s21, %s3688_s7  ;;  %p3691_p5 = scmp.lt.s32.totalorder %s3689_s23, %s3683_s25 }
 0x896   : > { %p3686_p0 = pneg %p3685_p13 }
 0x897   : > { %p3692_p6 = por %p3691_p5, %p3690_p11 }
 0x899   : > { %p3693_p4 = pnand %p3692_p6, %p3686_p0 }
 0x89b   : > { %3696 = shalt.err (!%p3693_p4)
}
 0x89c   : > { %s3697_s17 = scalar_lea.hbm %s4575_s22, 128  ;;  %s3701_s11 = scalar_lea.hbm %s4683_s10, 256 }
 0x89d   : > { %p3698_p8 = scmp.ne.s32.totalorder %s4575_s22, %s3697_s17  ;;  %p3702_p3 = scmp.lt.s32.totalorder %s4575_s22, %s4683_s10 }
 0x89e   : > { %p3703_p10 = scmp.lt.s32.totalorder %s3701_s11, %s3697_s17 }
 0x89f   : > { %p3699_p9 = pnand %p3698_p8, %p4734_p7 }
 0x8a0   : > { %p3704_p12 = por %p3703_p10, %p3702_p3 }
 0x8a1   : > { %p3700_p2 = pneg %p3699_p9 }
 0x8a3   : > { %p3705_p1 = pnand %p3704_p12, %p3700_p2 }
 0x8a5   : > { %3708 = shalt.err (!%p3705_p1)
}
 0x8a6   : > { %3375 = dma.vmem_to_hbm [thread:$0]  (%p4734_p7), %s4577_s21, 128, %s4575_s22, %s4609_s27  }
 0x8a7   : > { %s3709_s3 = scalar_lea.vmem %s4559_s6, 128  ;;  %s3800_s19 = smov [#allocation14]  }
 0x8a8   : > { %p3710_p13 = scmp.ne.s32.totalorder %s4559_s6, %s3709_s3  ;;  %s3713_s1 = sshll.u32 %s3800_s19, 4  ;;  %s3714_s1 = int_to_ptr.vmem [resolvable:$false] %s3713_s1 }
 0x8a9   : > { %s3715_s5 = scalar_lea.vmem %s3714_s1, 256  ;;  %p3716_p5 = scmp.lt.s32.totalorder %s4559_s6, %s3714_s1 }
 0x8aa   : > { %p3711_p0 = pnand %p3710_p13, %p4734_p7  ;;  %p3717_p6 = scmp.lt.s32.totalorder %s3715_s5, %s3709_s3 }
 0x8ac   : > { %p3712_p11 = pneg %p3711_p0  ;;  %p3718_p4 = por %p3717_p6, %p3716_p5 }
 0x8ae   : > { %p3719_p8 = pnand %p3718_p4, %p3712_p11 }
 0x8b0   : > { %3722 = shalt.err (!%p3719_p8)
}
 0x8b1   : > { %s3723_s25 = scalar_lea.hbm %s4582_s18, 128  ;;  %s3727_s26 = scalar_lea.hbm %s4733_s0, 256 }
 0x8b2   : > { %p3724_p9 = scmp.ne.s32.totalorder %s4582_s18, %s3723_s25  ;;  %p3728_p10 = scmp.lt.s32.totalorder %s4582_s18, %s4733_s0 }
 0x8b3   : > { %p3729_p12 = scmp.lt.s32.totalorder %s3727_s26, %s3723_s25 }
 0x8b4   : > { %p3725_p2 = pnand %p3724_p9, %p4734_p7 }
 0x8b5   : > { %p3730_p1 = por %p3729_p12, %p3728_p10 }
 0x8b6   : > { %p3726_p3 = pneg %p3725_p2 }
 0x8b8   : > { %p3731_p13 = pnand %p3730_p1, %p3726_p3 }
 0x8ba   : > { %3734 = shalt.err (!%p3731_p13)
}
 0x8bb   : > { %3376 = dma.vmem_to_hbm [thread:$0]  (%p4734_p7), %s4559_s6, 128, %s4582_s18, %s4609_s27  }
 0x8bc PF: > { %s4737_s17 = sld [smem:[#allocation20_spill]]  ;;  %p4740_p11 = scmp.ge.s32.totalorder %s3785_s16, 2 }
 0x8bd   : > { %s4738_s4 = sld [smem:[#allocation21_spill]] }
 0x8c2   : > { %s2779_s28 = sand.u32 1, %s4737_s17  }
 0x8c3   : > { %p4739_p0 = scmp.ne.s32.totalorder %s4738_s4, 0  ;;  %s2780_s11 = scalar_lea.sflag [#allocation4], %s2779_s28 }
 0x8c5   : > { %p3398_p5 = pnand %p4740_p11, %p4739_p0 }
 0x8c7   : > { %p3399_p6 = pneg %p3398_p5 }
 0x8c9   : > { %3764 = dma.done.wait (%p3399_p6), %s2780_s11, 128  }
 0x8ca   : > { %3766 = vsyncadd (%p3399_p6), %s2780_s11, 4294967168  ;;  %s4741_s24 = sadd.s32 4294967294, %s3785_s16  }
 0x8cb   : > { %s2788_s2 = sand.u32 1, %s4741_s24  }
 0x8cc   : > { %s2789_s29 = scalar_lea.sflag [#allocation13], %s2788_s2 }
 0x8cd   : > { %3768 = dma.done.wait (%p3399_p6), %s2789_s29, 256  }
 0x8ce   : > { %3770 = vsyncadd (%p3399_p6), %s2789_s29, 4294967040  ;;  %s4742_s6 = sld [smem:[#allocation22_spill]]  ;;  %p33_p7 = scmp.ge.s32.totalorder %s3978_s20, 4  }
 0x8cf   : > { %s4743_s29 = smov %s3777_s30  ;;  %s4744_s30 = smov %s3781_s15 }
 0x8d0   : > { %s4746_s16 = smov %s3978_s20  ;;  %35 = sbr.rel (!%p33_p7) target bundleno = 19 (0x13), region = 191 }
 0x8d4   : > { %s4745_s15 = smov %s4742_s6 }
 0x8d5   :  { %2824 = vsyncpa [#allocation3], 1 }
 0x8d6   :  { %2826 = vsyncpa [#allocation3 + $0x1], 1 }
 0x8d7   :  { %2827 = vsyncpa [#allocation6], 1 }
 0x8d8   :  { %2828 = vsyncpa [#allocation9], 1 }
 0x8d9   :  { %2829 = vsyncpa [#allocation4], 1 }
 0x8da   :  { %2831 = vsyncpa [#allocation4 + $0x1], 1 }
 0x8db   :  { %2832 = vsyncpa [#allocation13], 1 }
 0x8dc   :  { %2834 = vsyncpa [#allocation13 + $0x1], 1 }

</bundles_post_ra>
